<compile_context>
chip_gen: v5e
topology: v5e:2x2
jax: 0.10.0
libtpu: 0.0.40
codegen_flags: <defaults>
</compile_context>

<pallas_src>
import math
from functools import partial

import jax
import jax.numpy as jnp
import numpy as np
from jax.experimental import pallas as pl
from jax.experimental.pallas import tpu as pltpu

# ---- config consistent with MaskedProsodyModel defaults (shrunk for test) ----
BINS = 128         # args.bins
FILTER = 128       # args.filter_size (model dim D)   [default 256, shrunk]
CONV_FILTER = 128  # conv_filter_size
N_HEADS = 2        # args.n_heads
N_LAYERS = 2       # args.n_layers                    [default 8, shrunk]
KERNEL = 7         # args.kernel_size (conv along time)
B = 2
T = 16
EPS = 1e-5
HEAD_OUT = 2 * BINS + 128   # pitch | energy | vad padded to a full 128-lane block

LAYER_KEYS = ("wqkv", "bqkv", "wo", "bo", "ln1w", "ln1b",
              "w1", "b1", "w2", "b2", "ln2w", "ln2b")


# ----------------------------------------------------------------------------
# Kernel (one grid step == one conformer layer for one batch shard)
# ----------------------------------------------------------------------------
def _layer_norm(x, w, b):
    mu = jnp.mean(x, axis=-1, keepdims=True)
    var = jnp.mean((x - mu) ** 2, axis=-1, keepdims=True)
    return (x - mu) * jax.lax.rsqrt(var + EPS) * w + b


def _mm_bf16(a, w):
    # MXU matmul with bf16 operands, f32 accumulation.
    return jnp.dot(a.astype(jnp.bfloat16), w.astype(jnp.bfloat16),
                   preferred_element_type=jnp.float32)


def conformer_step_kernel(x_ref,
                          wqkv_ref, bqkv_ref, wo_ref, bo_ref,
                          ln1w_ref, ln1b_ref,
                          w1_ref, b1_ref, w2_ref, b2_ref,
                          ln2w_ref, ln2b_ref,
                          wh_ref, bh_ref,
                          out_ref,
                          x_sc,
                          *, n_heads, conv_k, nb, t):
    l = pl.program_id(1)
    n_layers = pl.num_programs(1)

    # Load the activations into the carried VMEM scratch on the first layer step.
    @pl.when(l == 0)
    def _():
        x_sc[...] = x_ref[...]

    x = x_sc[...]                                   # (nb*t, D) f32
    d = x.shape[-1]
    hd = d // n_heads
    scale = 1.0 / math.sqrt(hd)
    pad = conv_k // 2

    # Static per-head lane masks (VPU-only; no cross-lane shuffles).
    lane = jax.lax.broadcasted_iota(jnp.int32, (1, d), 1)
    head_masks = [jnp.logical_and(lane >= h * hd, lane < (h + 1) * hd)
                  .astype(jnp.float32) for h in range(n_heads)]

    # --- multi-head self-attention (post-norm TransformerEncoderLayer) ---
    # Heads are packed along the sublane axis: Q is head-masked and stacked to
    # (H*t, d); contracting the full d against K keeps heads separated, and the
    # row-wise softmax is automatically per-head.
    qkv = _mm_bf16(x, wqkv_ref[...]) + bqkv_ref[...]             # (nb*t, 3D)
    q, k_, v = qkv[:, :d], qkv[:, d:2 * d], qkv[:, 2 * d:]
    attn_rows = []
    for b in range(nb):                                          # static over batch
        r0 = b * t
        qb, kb, vb = q[r0:r0 + t], k_[r0:r0 + t], v[r0:r0 + t]   # (t, d) each
        q_packed = jnp.concatenate([qb * m for m in head_masks], axis=0) * scale
        # (H*t, d) . (t, d) contracting last dims -> (H*t, t); no K transpose.
        s = jax.lax.dot_general(q_packed, kb, (((1,), (1,)), ((), ())),
                                preferred_element_type=jnp.float32)
        s = s - jnp.max(s, axis=-1, keepdims=True)
        p = jnp.exp(s)
        p = p * pl.reciprocal(jnp.sum(p, axis=-1, keepdims=True), approx=True)
        r = jnp.dot(p, vb, preferred_element_type=jnp.float32)   # (H*t, d)
        # Recombine: head h output lives in rows [h*t:(h+1)*t], columns of head h.
        ab = sum(r[h * t:(h + 1) * t] * head_masks[h] for h in range(n_heads))
        attn_rows.append(ab)                                     # (t, d)
    attn = jnp.concatenate(attn_rows, axis=0)                    # (nb*t, d)
    attn = _mm_bf16(attn, wo_ref[...]) + bo_ref[...]
    x = _layer_norm(x + attn, ln1w_ref[...], ln1b_ref[...])

    # --- conv FF: Conv1d(D->F, k=7, 'same') -> ReLU -> Conv1d(F->D, 1) ---
    # im2col assembled in bf16 (half the staging footprint), one deep-K matmul.
    x_bf = x.astype(jnp.bfloat16)
    zeros = jnp.zeros((pad, d), dtype=jnp.bfloat16)
    col_rows = []
    for b in range(nb):
        xb = x_bf[b * t:(b + 1) * t]
        xp = jnp.concatenate([zeros, xb, zeros], axis=0)         # (t + 2*pad, d)
        taps = [xp[ki:ki + t] for ki in range(conv_k)]
        col_rows.append(jnp.concatenate(taps, axis=-1))          # (t, conv_k*d)
    cols = jnp.concatenate(col_rows, axis=0)                     # (nb*t, conv_k*d) bf16
    h1 = jnp.maximum(jnp.dot(cols, w1_ref[...],
                             preferred_element_type=jnp.float32) + b1_ref[...], 0.0)
    ff = _mm_bf16(h1, w2_ref[...]) + b2_ref[...]
    x = _layer_norm(x + ff, ln2w_ref[...], ln2b_ref[...])

    x_sc[...] = x                                                # carry to next layer

    # --- fused output heads on the final layer step ---
    @pl.when(l == n_layers - 1)
    def _():
        out_ref[...] = _mm_bf16(x, wh_ref[...]) + bh_ref[...]


# ----------------------------------------------------------------------------
# One-time weight preparation (outside the jitted forward)
# ----------------------------------------------------------------------------
def prepare_params(params):
    """Stack per-layer weights along a leading layer axis, reshape the conv
    weight for im2col, and fuse the three output heads into one lane-dense
    weight.  Run once; the result is what the jitted forward consumes."""
    def stacked(key, post=lambda a: a):
        return jnp.stack([post(L[key]) for L in params["layers"]], axis=0)

    H = params["heads"]
    prep = {
        "pitch_emb": params["pitch_emb"],
        "energy_emb": params["energy_emb"],
        "vad_emb": params["vad_emb"],
        "wqkv": stacked("wqkv"), "bqkv": stacked("bqkv"),
        "wo": stacked("wo"), "bo": stacked("bo"),
        "ln1w": stacked("ln1w"), "ln1b": stacked("ln1b"),
        "w1": stacked("w1", lambda a: a.reshape(KERNEL * FILTER, CONV_FILTER)),
        "b1": stacked("b1"),
        "w2": stacked("w2"), "b2": stacked("b2"),
        "ln2w": stacked("ln2w"), "ln2b": stacked("ln2b"),
        # [pitch | energy | vad padded to 128 lanes]
        "wh": jnp.concatenate(
            [H["wp"], H["we"], jnp.pad(H["wv"], ((0, 0), (0, 128 - 1)))], axis=-1),
        "bh": jnp.concatenate(
            [H["bp"], H["be"], jnp.pad(H["bv"], ((0, 0), (0, 128 - 1)))], axis=-1),
    }
    return jax.device_put(prep)


def choose_batch_shards(batch, t):
    """Only split across v7x's 2 TensorCores when each shard still keeps the
    MXU reasonably fed (>= 128 rows); single-TC chips always use one block."""
    try:
        kind = jax.devices()[0].device_kind.lower()
    except Exception:
        kind = ""
    if "v7" in kind and batch % 2 == 0 and (batch // 2) * t >= 128:
        return 2
    return 1


def sinusoidal_pe(t, d):
    # TODO(synk): PositionalEncoding source not provided; standard sinusoidal add assumed.
    pos = jnp.arange(t, dtype=jnp.float32)[:, None]
    div = jnp.exp(jnp.arange(0, d, 2, dtype=jnp.float32) * (-math.log(10000.0) / d))
    pe = jnp.zeros((t, d), jnp.float32)
    pe = pe.at[:, 0::2].set(jnp.sin(pos * div))
    pe = pe.at[:, 1::2].set(jnp.cos(pos * div))
    return pe


# ----------------------------------------------------------------------------
# Jitted forward
# ----------------------------------------------------------------------------
@partial(jax.jit, static_argnames=("batch_shards",))
def masked_prosody_forward(ids, prep, batch_shards=1):
    # ids: (B, 3, T) int32 -- same layout as the PyTorch forward (x[:, 0] = pitch ids).
    pitch = prep["pitch_emb"][ids[:, 0]]
    energy = prep["energy_emb"][ids[:, 1]]
    vad = prep["vad_emb"][ids[:, 2]]
    x = pitch + energy + vad                                   # (B, T, D)
    b, t, d = x.shape
    x = x + sinusoidal_pe(t, d)[None]
    x2d = x.reshape(b * t, d)

    n_layers = prep["wqkv"].shape[0]
    assert b % batch_shards == 0
    nb = b // batch_shards

    def wspec(name):
        a = prep[name]
        nd = a.ndim
        # Leading layer dim squeezed; streamed (double-buffered) along grid axis l.
        return pl.BlockSpec((None,) + a.shape[1:],
                            lambda i, l, _nd=nd: (l,) + (0,) * (_nd - 1))

    in_specs = ([pl.BlockSpec((nb * t, d), lambda i, l: (i, 0))]
                + [wspec(n) for n in LAYER_KEYS]
                + [pl.BlockSpec(prep["wh"].shape, lambda i, l: (0, 0)),
                   pl.BlockSpec(prep["bh"].shape, lambda i, l: (0, 0))])

    # Advisory cost estimate for XLA scheduling around the custom call.
    M = b * t
    flops_layer = (2 * M * d * 3 * d + 2 * M * d * d
                   + b * (2 * (N_HEADS * t) * d * t + 2 * (N_HEADS * t) * t * d)
                   + 2 * M * (KERNEL * d) * CONV_FILTER + 2 * M * CONV_FILTER * d)
    flops = n_layers * flops_layer + 2 * M * d * HEAD_OUT

    def _nbytes(a):
        return int(np.prod(a.shape)) * jnp.dtype(a.dtype).itemsize

    weight_bytes = (sum(_nbytes(prep[n]) for n in LAYER_KEYS)
                    + _nbytes(prep["wh"]) + _nbytes(prep["bh"]))
    cost = pl.CostEstimate(
        flops=int(flops),
        transcendentals=int(n_layers * (b * N_HEADS * t * t + 4 * M)),
        bytes_accessed=int(weight_bytes * batch_shards + M * d * 4 + M * HEAD_OUT * 4))

    kern = partial(conformer_step_kernel, n_heads=N_HEADS, conv_k=KERNEL, nb=nb, t=t)

    out = pl.pallas_call(
        kern,
        out_shape=jax.ShapeDtypeStruct((b * t, HEAD_OUT), jnp.float32),
        grid=(batch_shards, n_layers),
        in_specs=in_specs,
        out_specs=pl.BlockSpec((nb * t, HEAD_OUT), lambda i, l: (i, 0)),
        scratch_shapes=[pltpu.VMEM((nb * t, d), jnp.float32)],
        compiler_params=pltpu.CompilerParams(
            dimension_semantics=("parallel", "arbitrary")),
        cost_estimate=cost,
    )(x2d, *[prep[n] for n in LAYER_KEYS], prep["wh"], prep["bh"])

    out = out.reshape(b, t, HEAD_OUT)
    return (out[..., :BINS],                     # pitch logits  (B, T, BINS)
            out[..., BINS:2 * BINS],             # energy logits (B, T, BINS)
            out[..., 2 * BINS:2 * BINS + 1])     # vad logits    (B, T, 1)


# ----------------------------------------------------------------------------
# Parameters
# ----------------------------------------------------------------------------
def init_params(key):
    keys = iter(jax.random.split(key, 16 + 16 * N_LAYERS))

    def nrm(shape, std=0.02, dtype=jnp.bfloat16):
        return (jax.random.normal(next(keys), shape, jnp.float32) * std).astype(dtype)

    params = {
        "pitch_emb": nrm((BINS + 2, FILTER), dtype=jnp.float32),
        "energy_emb": nrm((BINS + 2, FILTER), dtype=jnp.float32),
        "vad_emb": nrm((2 + 2, FILTER), dtype=jnp.float32),
        "layers": [],
        "heads": {
            "wp": nrm((FILTER, BINS)), "bp": jnp.zeros((1, BINS), jnp.float32),
            "we": nrm((FILTER, BINS)), "be": jnp.zeros((1, BINS), jnp.float32),
            "wv": nrm((FILTER, 1)),    "bv": jnp.zeros((1, 1), jnp.float32),
        },
    }
    for _ in range(N_LAYERS):
        params["layers"].append({
            # Linear weights pre-transposed to (in, out), stored bf16 (MXU-native).
            "wqkv": nrm((FILTER, 3 * FILTER)),
            "bqkv": jnp.zeros((1, 3 * FILTER), jnp.float32),
            "wo": nrm((FILTER, FILTER)),
            "bo": jnp.zeros((1, FILTER), jnp.float32),
            "ln1w": jnp.ones((1, FILTER), jnp.float32),
            "ln1b": jnp.zeros((1, FILTER), jnp.float32),
            # Conv1d(D, F, 7) weight stored as (K, D_in, F_out); Conv1d(F, D, 1) as (F, D).
            "w1": nrm((KERNEL, FILTER, CONV_FILTER)),
            "b1": jnp.zeros((1, CONV_FILTER), jnp.float32),
            "w2": nrm((CONV_FILTER, FILTER)),
            "b2": jnp.zeros((1, FILTER), jnp.float32),
            "ln2w": jnp.ones((1, FILTER), jnp.float32),
            "ln2b": jnp.zeros((1, FILTER), jnp.float32),
        })
    return params


# ----------------------------------------------------------------------------
# Pure-JAX reference (f32 math, same params) for a sanity check
# ----------------------------------------------------------------------------
def _ref_forward(ids, params):
    def ln(v, w, b):
        mu = v.mean(-1, keepdims=True)
        var = ((v - mu) ** 2).mean(-1, keepdims=True)
        return (v - mu) / jnp.sqrt(var + EPS) * w + b

    f32 = lambda a: a.astype(jnp.float32)
    x = (params["pitch_emb"][ids[:, 0]] + params["energy_emb"][ids[:, 1]]
         + params["vad_emb"][ids[:, 2]])
    x = x + sinusoidal_pe(x.shape[1], x.shape[2])[None]
    d = x.shape[-1]
    hd = d // N_HEADS
    for L in params["layers"]:
        qkv = x @ f32(L["wqkv"]) + L["bqkv"]
        q, k, v = qkv[..., :d], qkv[..., d:2 * d], qkv[..., 2 * d:]
        heads = []
        for h in range(N_HEADS):
            sl = slice(h * hd, (h + 1) * hd)
            s = jnp.einsum("btd,bsd->bts", q[..., sl], k[..., sl]) / math.sqrt(hd)
            p = jax.nn.softmax(s, axis=-1)
            heads.append(jnp.einsum("bts,bsd->btd", p, v[..., sl]))
        attn = jnp.concatenate(heads, -1) @ f32(L["wo"]) + L["bo"]
        x1 = ln(x + attn, L["ln1w"], L["ln1b"])
        pad = KERNEL // 2
        xp = jnp.pad(x1, ((0, 0), (pad, pad), (0, 0)))
        t = x.shape[1]
        hcv = sum(jnp.einsum("btd,df->btf", xp[:, kk:kk + t], f32(L["w1"][kk]))
                  for kk in range(KERNEL))
        hcv = jax.nn.relu(hcv + L["b1"])
        ff = hcv @ f32(L["w2"]) + L["b2"]
        x = ln(x1 + ff, L["ln2w"], L["ln2b"])
    H = params["heads"]
    pitch = x @ f32(H["wp"]) + H["bp"]
    energy = x @ f32(H["we"]) + H["be"]
    vad = x @ f32(H["wv"]) + H["bv"]
    return pitch, energy, vad


# ----------------------------------------------------------------------------
if __name__ == "__main__":
    key = jax.random.PRNGKey(0)
    k_ids, k_vad, k_par = jax.random.split(key, 3)
    pitch_ids = jax.random.randint(k_ids, (B, T), 0, BINS, dtype=jnp.int32)
    energy_ids = jax.random.randint(jax.random.fold_in(k_ids, 1), (B, T), 0, BINS, dtype=jnp.int32)
    vad_ids = jax.random.randint(k_vad, (B, T), 0, 2, dtype=jnp.int32)
    ids = jnp.stack([pitch_ids, energy_ids, vad_ids], axis=1)   # (B, 3, T)

    params = init_params(k_par)
    prep = prepare_params(params)            # one-time weight prep (outside jit)
    shards = choose_batch_shards(B, T)       # explicit, size-gated 2-TC split

    pitch_out, energy_out, vad_out = masked_prosody_forward(ids, prep, batch_shards=shards)
    jax.block_until_ready((pitch_out, energy_out, vad_out))

    assert pitch_out.shape == (B, T, BINS)
    assert energy_out.shape == (B, T, BINS)
    assert vad_out.shape == (B, T, 1)

    rp, re, rv = _ref_forward(ids, params)
    # bf16 MXU operands + approx softmax reciprocal vs f32 reference.
    np.testing.assert_allclose(np.asarray(pitch_out), np.asarray(rp), rtol=3e-2, atol=3e-2)
    np.testing.assert_allclose(np.asarray(energy_out), np.asarray(re), rtol=3e-2, atol=3e-2)
    np.testing.assert_allclose(np.asarray(vad_out), np.asarray(rv), rtol=3e-2, atol=3e-2)

    print("KERNEL_OK")
</pallas_src>

<mosaic_0001>
module attributes {stable_mosaic.version = 11 : i64} {
  func.func @conformer_step_kernel(%arg0: i32, %arg1: i32, %arg2: memref<32x128xf32, #tpu.memory_space<vmem>>, %arg3: memref<1x128x384xbf16, #tpu.memory_space<vmem>>, %arg4: memref<1x1x384xf32, #tpu.memory_space<vmem>>, %arg5: memref<1x128x128xbf16, #tpu.memory_space<vmem>>, %arg6: memref<1x1x128xf32, #tpu.memory_space<vmem>>, %arg7: memref<1x1x128xf32, #tpu.memory_space<vmem>>, %arg8: memref<1x1x128xf32, #tpu.memory_space<vmem>>, %arg9: memref<1x896x128xbf16, #tpu.memory_space<vmem>>, %arg10: memref<1x1x128xf32, #tpu.memory_space<vmem>>, %arg11: memref<1x128x128xbf16, #tpu.memory_space<vmem>>, %arg12: memref<1x1x128xf32, #tpu.memory_space<vmem>>, %arg13: memref<1x1x128xf32, #tpu.memory_space<vmem>>, %arg14: memref<1x1x128xf32, #tpu.memory_space<vmem>>, %arg15: memref<128x384xbf16, #tpu.memory_space<vmem>>, %arg16: memref<1x384xf32, #tpu.memory_space<vmem>>, %arg17: memref<32x384xf32, #tpu.memory_space<vmem>>, %arg18: memref<32x128xf32, #tpu.memory_space<vmem>>) attributes {dimension_semantics = [#tpu.dimension_semantics<parallel>, #tpu.dimension_semantics<arbitrary>], iteration_bounds = array<i64: 1, 2>, scalar_prefetch = 0 : i64, scratch_operands = 1 : i64, tpu.core_type = #tpu.core_type<tc>, window_params = [{transform_indices = @transform_0, window_bounds = array<i64: 32, 128>}, {transform_indices = @transform_1, window_bounds = array<i64: 1, 128, 384>}, {transform_indices = @transform_2, window_bounds = array<i64: 1, 1, 384>}, {transform_indices = @transform_3, window_bounds = array<i64: 1, 128, 128>}, {transform_indices = @transform_4, window_bounds = array<i64: 1, 1, 128>}, {transform_indices = @transform_5, window_bounds = array<i64: 1, 1, 128>}, {transform_indices = @transform_6, window_bounds = array<i64: 1, 1, 128>}, {transform_indices = @transform_7, window_bounds = array<i64: 1, 896, 128>}, {transform_indices = @transform_8, window_bounds = array<i64: 1, 1, 128>}, {transform_indices = @transform_9, window_bounds = array<i64: 1, 128, 128>}, {transform_indices = @transform_10, window_bounds = array<i64: 1, 1, 128>}, {transform_indices = @transform_11, window_bounds = array<i64: 1, 1, 128>}, {transform_indices = @transform_12, window_bounds = array<i64: 1, 1, 128>}, {pipeline_mode = #tpu.pipeline_mode<synchronous>, transform_indices = @transform_13, window_bounds = array<i64: 128, 384>}, {pipeline_mode = #tpu.pipeline_mode<synchronous>, transform_indices = @transform_14, window_bounds = array<i64: 1, 384>}, {transform_indices = @transform_15, window_bounds = array<i64: 32, 384>}]} {
    %c0_i32 = arith.constant 0 : i32
    %0 = arith.cmpi eq, %arg1, %c0_i32 : i32
    %1 = arith.extui %0 : i1 to i32
    %c0_i32_0 = arith.constant 0 : i32
    %2 = arith.cmpi ne, %1, %c0_i32_0 : i32
    scf.if %2 {
      %c0_70 = arith.constant 0 : index
      %c0_71 = arith.constant 0 : index
      %199 = vector.load %arg2[%c0_70, %c0_71] : memref<32x128xf32, #tpu.memory_space<vmem>>, vector<32x128xf32>
      %c0_72 = arith.constant 0 : index
      %c0_73 = arith.constant 0 : index
      %200 = vector.load %arg18[%c0_72, %c0_73] : memref<32x128xf32, #tpu.memory_space<vmem>>, vector<32x128xf32>
      tpu.vector_store %arg18[%c0_72, %c0_73], %199 {strides = array<i32>} : memref<32x128xf32, #tpu.memory_space<vmem>>, vector<32x128xf32>,
    } else {
    }
    %c0 = arith.constant 0 : index
    %c0_1 = arith.constant 0 : index
    %3 = vector.load %arg18[%c0, %c0_1] : memref<32x128xf32, #tpu.memory_space<vmem>>, vector<32x128xf32>
    %4 = tpu.iota {dimensions = array<i32: 1>} : vector<1x128xi32>
    %c0_i32_2 = arith.constant 0 : i32
    %5 = vector.broadcast %c0_i32_2 : i32 to vector<1x128xi32>
    %6 = arith.cmpi sge, %4, %5 : vector<1x128xi32>
    %c64_i32 = arith.constant 64 : i32
    %7 = vector.broadcast %c64_i32 : i32 to vector<1x128xi32>
    %8 = arith.cmpi slt, %4, %7 : vector<1x128xi32>
    %9 = arith.andi %6, %8 : vector<1x128xi1>
    %10 = arith.extui %9 : vector<1x128xi1> to vector<1x128xi32>
    %11 = arith.sitofp %10 : vector<1x128xi32> to vector<1x128xf32>
    %c64_i32_3 = arith.constant 64 : i32
    %12 = vector.broadcast %c64_i32_3 : i32 to vector<1x128xi32>
    %13 = arith.cmpi sge, %4, %12 : vector<1x128xi32>
    %c128_i32 = arith.constant 128 : i32
    %14 = vector.broadcast %c128_i32 : i32 to vector<1x128xi32>
    %15 = arith.cmpi slt, %4, %14 : vector<1x128xi32>
    %16 = arith.andi %13, %15 : vector<1x128xi1>
    %17 = arith.extui %16 : vector<1x128xi1> to vector<1x128xi32>
    %18 = arith.sitofp %17 : vector<1x128xi32> to vector<1x128xf32>
    %c0_4 = arith.constant 0 : index
    %c0_5 = arith.constant 0 : index
    %c0_6 = arith.constant 0 : index
    %19 = vector.load %arg3[%c0_4, %c0_5, %c0_6] : memref<1x128x384xbf16, #tpu.memory_space<vmem>>, vector<1x128x384xbf16>
    %20 = vector.shape_cast %19 : vector<1x128x384xbf16> to vector<128x384xbf16>
    %21 = arith.truncf %3 : vector<32x128xf32> to vector<32x128xbf16>
    %cst = arith.constant dense<0.000000e+00> : vector<32x384xf32>
    %22 = tpu.matmul %21, %20, %cst {dimension_numbers = #tpu.dot_dimension_numbers<[1], [0], [0], [1], [0, 0, 1, 1], [], []>} : vector<32x128xbf16>, vector<128x384xbf16>, vector<32x384xf32> -> vector<32x384xf32>
    %c0_7 = arith.constant 0 : index
    %c0_8 = arith.constant 0 : index
    %c0_9 = arith.constant 0 : index
    %23 = vector.load %arg4[%c0_7, %c0_8, %c0_9] : memref<1x1x384xf32, #tpu.memory_space<vmem>>, vector<1x1x384xf32>
    %24 = vector.shape_cast %23 : vector<1x1x384xf32> to vector<1x384xf32>
    %25 = vector.broadcast %24 : vector<1x384xf32> to vector<32x384xf32>
    %26 = arith.addf %22, %25 : vector<32x384xf32>
    %27 = vector.extract_strided_slice %26 {offsets = [0, 0], sizes = [32, 128], strides = [1, 1]} : vector<32x384xf32> to vector<32x128xf32>
    %28 = vector.extract_strided_slice %26 {offsets = [0, 128], sizes = [32, 128], strides = [1, 1]} : vector<32x384xf32> to vector<32x128xf32>
    %29 = vector.extract_strided_slice %26 {offsets = [0, 256], sizes = [32, 128], strides = [1, 1]} : vector<32x384xf32> to vector<32x128xf32>
    %30 = vector.extract_strided_slice %27 {offsets = [0, 0], sizes = [16, 128], strides = [1, 1]} : vector<32x128xf32> to vector<16x128xf32>
    %31 = vector.extract_strided_slice %28 {offsets = [0, 0], sizes = [16, 128], strides = [1, 1]} : vector<32x128xf32> to vector<16x128xf32>
    %32 = vector.extract_strided_slice %29 {offsets = [0, 0], sizes = [16, 128], strides = [1, 1]} : vector<32x128xf32> to vector<16x128xf32>
    %33 = vector.broadcast %11 : vector<1x128xf32> to vector<16x128xf32>
    %34 = arith.mulf %30, %33 : vector<16x128xf32>
    %35 = vector.broadcast %18 : vector<1x128xf32> to vector<16x128xf32>
    %36 = arith.mulf %30, %35 : vector<16x128xf32>
    %37 = tpu.concatenate %34, %36 in 0 : vector<16x128xf32>, vector<16x128xf32> -> vector<32x128xf32>
    %cst_10 = arith.constant 1.250000e-01 : f32
    %38 = vector.broadcast %cst_10 : f32 to vector<32x128xf32>
    %39 = arith.mulf %37, %38 : vector<32x128xf32>
    %cst_11 = arith.constant dense<0.000000e+00> : vector<32x16xf32>
    %40 = tpu.matmul %39, %31, %cst_11 {dimension_numbers = #tpu.dot_dimension_numbers<[1], [1], [0], [0], [0, 0, 1, 0], [], []>} : vector<32x128xf32>, vector<16x128xf32>, vector<32x16xf32> -> vector<32x16xf32>
    %cst_12 = arith.constant dense<0xFF800000> : vector<32xf32>
    %41 = vector.multi_reduction <maximumf>, %40, %cst_12 [1] : vector<32x16xf32> to vector<32xf32>
    %42 = vector.shape_cast %41 : vector<32xf32> to vector<32x1xf32>
    %43 = vector.broadcast %42 : vector<32x1xf32> to vector<32x16xf32>
    %44 = arith.subf %40, %43 : vector<32x16xf32>
    %45 = math.exp %44 : vector<32x16xf32>
    %cst_13 = arith.constant dense<0.000000e+00> : vector<32xf32>
    %46 = vector.multi_reduction <add>, %45, %cst_13 [1] : vector<32x16xf32> to vector<32xf32>
    %47 = vector.shape_cast %46 : vector<32xf32> to vector<32x1xf32>
    %48 = tpu.reciprocal %47 {approx = true} : vector<32x1xf32> -> vector<32x1xf32>
    %49 = vector.broadcast %48 : vector<32x1xf32> to vector<32x16xf32>
    %50 = arith.mulf %45, %49 : vector<32x16xf32>
    %cst_14 = arith.constant dense<0.000000e+00> : vector<32x128xf32>
    %51 = tpu.matmul %50, %32, %cst_14 {dimension_numbers = #tpu.dot_dimension_numbers<[1], [0], [0], [1], [0, 0, 1, 1], [], []>} : vector<32x16xf32>, vector<16x128xf32>, vector<32x128xf32> -> vector<32x128xf32>
    %52 = vector.extract_strided_slice %51 {offsets = [0, 0], sizes = [16, 128], strides = [1, 1]} : vector<32x128xf32> to vector<16x128xf32>
    %53 = vector.broadcast %11 : vector<1x128xf32> to vector<16x128xf32>
    %54 = arith.mulf %52, %53 : vector<16x128xf32>
    %cst_15 = arith.constant 0.000000e+00 : f32
    %55 = vector.broadcast %cst_15 : f32 to vector<16x128xf32>
    %56 = arith.addf %55, %54 : vector<16x128xf32>
    %57 = vector.extract_strided_slice %51 {offsets = [16, 0], sizes = [16, 128], strides = [1, 1]} : vector<32x128xf32> to vector<16x128xf32>
    %58 = vector.broadcast %18 : vector<1x128xf32> to vector<16x128xf32>
    %59 = arith.mulf %57, %58 : vector<16x128xf32>
    %60 = arith.addf %56, %59 : vector<16x128xf32>
    %61 = vector.extract_strided_slice %27 {offsets = [16, 0], sizes = [16, 128], strides = [1, 1]} : vector<32x128xf32> to vector<16x128xf32>
    %62 = vector.extract_strided_slice %28 {offsets = [16, 0], sizes = [16, 128], strides = [1, 1]} : vector<32x128xf32> to vector<16x128xf32>
    %63 = vector.extract_strided_slice %29 {offsets = [16, 0], sizes = [16, 128], strides = [1, 1]} : vector<32x128xf32> to vector<16x128xf32>
    %64 = vector.broadcast %11 : vector<1x128xf32> to vector<16x128xf32>
    %65 = arith.mulf %61, %64 : vector<16x128xf32>
    %66 = vector.broadcast %18 : vector<1x128xf32> to vector<16x128xf32>
    %67 = arith.mulf %61, %66 : vector<16x128xf32>
    %68 = tpu.concatenate %65, %67 in 0 : vector<16x128xf32>, vector<16x128xf32> -> vector<32x128xf32>
    %cst_16 = arith.constant 1.250000e-01 : f32
    %69 = vector.broadcast %cst_16 : f32 to vector<32x128xf32>
    %70 = arith.mulf %68, %69 : vector<32x128xf32>
    %cst_17 = arith.constant dense<0.000000e+00> : vector<32x16xf32>
    %71 = tpu.matmul %70, %62, %cst_17 {dimension_numbers = #tpu.dot_dimension_numbers<[1], [1], [0], [0], [0, 0, 1, 0], [], []>} : vector<32x128xf32>, vector<16x128xf32>, vector<32x16xf32> -> vector<32x16xf32>
    %cst_18 = arith.constant dense<0xFF800000> : vector<32xf32>
    %72 = vector.multi_reduction <maximumf>, %71, %cst_18 [1] : vector<32x16xf32> to vector<32xf32>
    %73 = vector.shape_cast %72 : vector<32xf32> to vector<32x1xf32>
    %74 = vector.broadcast %73 : vector<32x1xf32> to vector<32x16xf32>
    %75 = arith.subf %71, %74 : vector<32x16xf32>
    %76 = math.exp %75 : vector<32x16xf32>
    %cst_19 = arith.constant dense<0.000000e+00> : vector<32xf32>
    %77 = vector.multi_reduction <add>, %76, %cst_19 [1] : vector<32x16xf32> to vector<32xf32>
    %78 = vector.shape_cast %77 : vector<32xf32> to vector<32x1xf32>
    %79 = tpu.reciprocal %78 {approx = true} : vector<32x1xf32> -> vector<32x1xf32>
    %80 = vector.broadcast %79 : vector<32x1xf32> to vector<32x16xf32>
    %81 = arith.mulf %76, %80 : vector<32x16xf32>
    %cst_20 = arith.constant dense<0.000000e+00> : vector<32x128xf32>
    %82 = tpu.matmul %81, %63, %cst_20 {dimension_numbers = #tpu.dot_dimension_numbers<[1], [0], [0], [1], [0, 0, 1, 1], [], []>} : vector<32x16xf32>, vector<16x128xf32>, vector<32x128xf32> -> vector<32x128xf32>
    %83 = vector.extract_strided_slice %82 {offsets = [0, 0], sizes = [16, 128], strides = [1, 1]} : vector<32x128xf32> to vector<16x128xf32>
    %84 = vector.broadcast %11 : vector<1x128xf32> to vector<16x128xf32>
    %85 = arith.mulf %83, %84 : vector<16x128xf32>
    %cst_21 = arith.constant 0.000000e+00 : f32
    %86 = vector.broadcast %cst_21 : f32 to vector<16x128xf32>
    %87 = arith.addf %86, %85 : vector<16x128xf32>
    %88 = vector.extract_strided_slice %82 {offsets = [16, 0], sizes = [16, 128], strides = [1, 1]} : vector<32x128xf32> to vector<16x128xf32>
    %89 = vector.broadcast %18 : vector<1x128xf32> to vector<16x128xf32>
    %90 = arith.mulf %88, %89 : vector<16x128xf32>
    %91 = arith.addf %87, %90 : vector<16x128xf32>
    %92 = tpu.concatenate %60, %91 in 0 : vector<16x128xf32>, vector<16x128xf32> -> vector<32x128xf32>
    %c0_22 = arith.constant 0 : index
    %c0_23 = arith.constant 0 : index
    %c0_24 = arith.constant 0 : index
    %93 = vector.load %arg5[%c0_22, %c0_23, %c0_24] : memref<1x128x128xbf16, #tpu.memory_space<vmem>>, vector<1x128x128xbf16>
    %94 = vector.shape_cast %93 : vector<1x128x128xbf16> to vector<128x128xbf16>
    %95 = arith.truncf %92 : vector<32x128xf32> to vector<32x128xbf16>
    %cst_25 = arith.constant dense<0.000000e+00> : vector<32x128xf32>
    %96 = tpu.matmul %95, %94, %cst_25 {dimension_numbers = #tpu.dot_dimension_numbers<[1], [0], [0], [1], [0, 0, 1, 1], [], []>} : vector<32x128xbf16>, vector<128x128xbf16>, vector<32x128xf32> -> vector<32x128xf32>
    %c0_26 = arith.constant 0 : index
    %c0_27 = arith.constant 0 : index
    %c0_28 = arith.constant 0 : index
    %97 = vector.load %arg6[%c0_26, %c0_27, %c0_28] : memref<1x1x128xf32, #tpu.memory_space<vmem>>, vector<1x1x128xf32>
    %98 = vector.shape_cast %97 : vector<1x1x128xf32> to vector<1x128xf32>
    %99 = vector.broadcast %98 : vector<1x128xf32> to vector<32x128xf32>
    %100 = arith.addf %96, %99 : vector<32x128xf32>
    %101 = arith.addf %3, %100 : vector<32x128xf32>
    %c0_29 = arith.constant 0 : index
    %c0_30 = arith.constant 0 : index
    %c0_31 = arith.constant 0 : index
    %102 = vector.load %arg7[%c0_29, %c0_30, %c0_31] : memref<1x1x128xf32, #tpu.memory_space<vmem>>, vector<1x1x128xf32>
    %103 = vector.shape_cast %102 : vector<1x1x128xf32> to vector<1x128xf32>
    %c0_32 = arith.constant 0 : index
    %c0_33 = arith.constant 0 : index
    %c0_34 = arith.constant 0 : index
    %104 = vector.load %arg8[%c0_32, %c0_33, %c0_34] : memref<1x1x128xf32, #tpu.memory_space<vmem>>, vector<1x1x128xf32>
    %105 = vector.shape_cast %104 : vector<1x1x128xf32> to vector<1x128xf32>
    %cst_35 = arith.constant dense<0.000000e+00> : vector<32xf32>
    %106 = vector.multi_reduction <add>, %101, %cst_35 [1] : vector<32x128xf32> to vector<32xf32>
    %107 = vector.shape_cast %106 : vector<32xf32> to vector<32x1xf32>
    %cst_36 = arith.constant 1.280000e+02 : f32
    %108 = vector.broadcast %cst_36 : f32 to vector<32x1xf32>
    %109 = arith.divf %107, %108 : vector<32x1xf32>
    %110 = vector.broadcast %109 : vector<32x1xf32> to vector<32x128xf32>
    %111 = arith.subf %101, %110 : vector<32x128xf32>
    %112 = arith.mulf %111, %111 : vector<32x128xf32>
    %cst_37 = arith.constant dense<0.000000e+00> : vector<32xf32>
    %113 = vector.multi_reduction <add>, %112, %cst_37 [1] : vector<32x128xf32> to vector<32xf32>
    %114 = vector.shape_cast %113 : vector<32xf32> to vector<32x1xf32>
    %cst_38 = arith.constant 1.280000e+02 : f32
    %115 = vector.broadcast %cst_38 : f32 to vector<32x1xf32>
    %116 = arith.divf %114, %115 : vector<32x1xf32>
    %117 = vector.broadcast %109 : vector<32x1xf32> to vector<32x128xf32>
    %118 = arith.subf %101, %117 : vector<32x128xf32>
    %cst_39 = arith.constant 9.99999974E-6 : f32
    %119 = vector.broadcast %cst_39 : f32 to vector<32x1xf32>
    %120 = arith.addf %116, %119 : vector<32x1xf32>
    %121 = math.rsqrt %120 : vector<32x1xf32>
    %122 = vector.broadcast %121 : vector<32x1xf32> to vector<32x128xf32>
    %123 = arith.mulf %118, %122 : vector<32x128xf32>
    %124 = vector.broadcast %103 : vector<1x128xf32> to vector<32x128xf32>
    %125 = arith.mulf %123, %124 : vector<32x128xf32>
    %126 = vector.broadcast %105 : vector<1x128xf32> to vector<32x128xf32>
    %127 = arith.addf %125, %126 : vector<32x128xf32>
    %128 = arith.truncf %127 : vector<32x128xf32> to vector<32x128xbf16>
    %cst_40 = arith.constant 0.000000e+00 : bf16
    %129 = vector.broadcast %cst_40 : bf16 to vector<3x128xbf16>
    %130 = vector.extract_strided_slice %128 {offsets = [0, 0], sizes = [16, 128], strides = [1, 1]} : vector<32x128xbf16> to vector<16x128xbf16>
    %131 = tpu.concatenate %129, %130, %129 in 0 : vector<3x128xbf16>, vector<16x128xbf16>, vector<3x128xbf16> -> vector<22x128xbf16>
    %132 = vector.extract_strided_slice %131 {offsets = [0, 0], sizes = [16, 128], strides = [1, 1]} : vector<22x128xbf16> to vector<16x128xbf16>
    %133 = vector.extract_strided_slice %131 {offsets = [1, 0], sizes = [16, 128], strides = [1, 1]} : vector<22x128xbf16> to vector<16x128xbf16>
    %134 = vector.extract_strided_slice %131 {offsets = [2, 0], sizes = [16, 128], strides = [1, 1]} : vector<22x128xbf16> to vector<16x128xbf16>
    %135 = vector.extract_strided_slice %131 {offsets = [3, 0], sizes = [16, 128], strides = [1, 1]} : vector<22x128xbf16> to vector<16x128xbf16>
    %136 = vector.extract_strided_slice %131 {offsets = [4, 0], sizes = [16, 128], strides = [1, 1]} : vector<22x128xbf16> to vector<16x128xbf16>
    %137 = vector.extract_strided_slice %131 {offsets = [5, 0], sizes = [16, 128], strides = [1, 1]} : vector<22x128xbf16> to vector<16x128xbf16>
    %138 = vector.extract_strided_slice %131 {offsets = [6, 0], sizes = [16, 128], strides = [1, 1]} : vector<22x128xbf16> to vector<16x128xbf16>
    %139 = tpu.concatenate %132, %133, %134, %135, %136, %137, %138 in 1 : vector<16x128xbf16>, vector<16x128xbf16>, vector<16x128xbf16>, vector<16x128xbf16>, vector<16x128xbf16>, vector<16x128xbf16>, vector<16x128xbf16> -> vector<16x896xbf16>
    %140 = vector.extract_strided_slice %128 {offsets = [16, 0], sizes = [16, 128], strides = [1, 1]} : vector<32x128xbf16> to vector<16x128xbf16>
    %141 = tpu.concatenate %129, %140, %129 in 0 : vector<3x128xbf16>, vector<16x128xbf16>, vector<3x128xbf16> -> vector<22x128xbf16>
    %142 = vector.extract_strided_slice %141 {offsets = [0, 0], sizes = [16, 128], strides = [1, 1]} : vector<22x128xbf16> to vector<16x128xbf16>
    %143 = vector.extract_strided_slice %141 {offsets = [1, 0], sizes = [16, 128], strides = [1, 1]} : vector<22x128xbf16> to vector<16x128xbf16>
    %144 = vector.extract_strided_slice %141 {offsets = [2, 0], sizes = [16, 128], strides = [1, 1]} : vector<22x128xbf16> to vector<16x128xbf16>
    %145 = vector.extract_strided_slice %141 {offsets = [3, 0], sizes = [16, 128], strides = [1, 1]} : vector<22x128xbf16> to vector<16x128xbf16>
    %146 = vector.extract_strided_slice %141 {offsets = [4, 0], sizes = [16, 128], strides = [1, 1]} : vector<22x128xbf16> to vector<16x128xbf16>
    %147 = vector.extract_strided_slice %141 {offsets = [5, 0], sizes = [16, 128], strides = [1, 1]} : vector<22x128xbf16> to vector<16x128xbf16>
    %148 = vector.extract_strided_slice %141 {offsets = [6, 0], sizes = [16, 128], strides = [1, 1]} : vector<22x128xbf16> to vector<16x128xbf16>
    %149 = tpu.concatenate %142, %143, %144, %145, %146, %147, %148 in 1 : vector<16x128xbf16>, vector<16x128xbf16>, vector<16x128xbf16>, vector<16x128xbf16>, vector<16x128xbf16>, vector<16x128xbf16>, vector<16x128xbf16> -> vector<16x896xbf16>
    %150 = tpu.concatenate %139, %149 in 0 : vector<16x896xbf16>, vector<16x896xbf16> -> vector<32x896xbf16>
    %c0_41 = arith.constant 0 : index
    %c0_42 = arith.constant 0 : index
    %c0_43 = arith.constant 0 : index
    %151 = vector.load %arg9[%c0_41, %c0_42, %c0_43] : memref<1x896x128xbf16, #tpu.memory_space<vmem>>, vector<1x896x128xbf16>
    %152 = vector.shape_cast %151 : vector<1x896x128xbf16> to vector<896x128xbf16>
    %cst_44 = arith.constant dense<0.000000e+00> : vector<32x128xf32>
    %153 = tpu.matmul %150, %152, %cst_44 {dimension_numbers = #tpu.dot_dimension_numbers<[1], [0], [0], [1], [0, 0, 1, 1], [], []>} : vector<32x896xbf16>, vector<896x128xbf16>, vector<32x128xf32> -> vector<32x128xf32>
    %c0_45 = arith.constant 0 : index
    %c0_46 = arith.constant 0 : index
    %c0_47 = arith.constant 0 : index
    %154 = vector.load %arg10[%c0_45, %c0_46, %c0_47] : memref<1x1x128xf32, #tpu.memory_space<vmem>>, vector<1x1x128xf32>
    %155 = vector.shape_cast %154 : vector<1x1x128xf32> to vector<1x128xf32>
    %156 = vector.broadcast %155 : vector<1x128xf32> to vector<32x128xf32>
    %157 = arith.addf %153, %156 : vector<32x128xf32>
    %cst_48 = arith.constant 0.000000e+00 : f32
    %158 = vector.broadcast %cst_48 : f32 to vector<32x128xf32>
    %159 = arith.maximumf %157, %158 : vector<32x128xf32>
    %c0_49 = arith.constant 0 : index
    %c0_50 = arith.constant 0 : index
    %c0_51 = arith.constant 0 : index
    %160 = vector.load %arg11[%c0_49, %c0_50, %c0_51] : memref<1x128x128xbf16, #tpu.memory_space<vmem>>, vector<1x128x128xbf16>
    %161 = vector.shape_cast %160 : vector<1x128x128xbf16> to vector<128x128xbf16>
    %162 = arith.truncf %159 : vector<32x128xf32> to vector<32x128xbf16>
    %cst_52 = arith.constant dense<0.000000e+00> : vector<32x128xf32>
    %163 = tpu.matmul %162, %161, %cst_52 {dimension_numbers = #tpu.dot_dimension_numbers<[1], [0], [0], [1], [0, 0, 1, 1], [], []>} : vector<32x128xbf16>, vector<128x128xbf16>, vector<32x128xf32> -> vector<32x128xf32>
    %c0_53 = arith.constant 0 : index
    %c0_54 = arith.constant 0 : index
    %c0_55 = arith.constant 0 : index
    %164 = vector.load %arg12[%c0_53, %c0_54, %c0_55] : memref<1x1x128xf32, #tpu.memory_space<vmem>>, vector<1x1x128xf32>
    %165 = vector.shape_cast %164 : vector<1x1x128xf32> to vector<1x128xf32>
    %166 = vector.broadcast %165 : vector<1x128xf32> to vector<32x128xf32>
    %167 = arith.addf %163, %166 : vector<32x128xf32>
    %168 = arith.addf %127, %167 : vector<32x128xf32>
    %c0_56 = arith.constant 0 : index
    %c0_57 = arith.constant 0 : index
    %c0_58 = arith.constant 0 : index
    %169 = vector.load %arg13[%c0_56, %c0_57, %c0_58] : memref<1x1x128xf32, #tpu.memory_space<vmem>>, vector<1x1x128xf32>
    %170 = vector.shape_cast %169 : vector<1x1x128xf32> to vector<1x128xf32>
    %c0_59 = arith.constant 0 : index
    %c0_60 = arith.constant 0 : index
    %c0_61 = arith.constant 0 : index
    %171 = vector.load %arg14[%c0_59, %c0_60, %c0_61] : memref<1x1x128xf32, #tpu.memory_space<vmem>>, vector<1x1x128xf32>
    %172 = vector.shape_cast %171 : vector<1x1x128xf32> to vector<1x128xf32>
    %cst_62 = arith.constant dense<0.000000e+00> : vector<32xf32>
    %173 = vector.multi_reduction <add>, %168, %cst_62 [1] : vector<32x128xf32> to vector<32xf32>
    %174 = vector.shape_cast %173 : vector<32xf32> to vector<32x1xf32>
    %cst_63 = arith.constant 1.280000e+02 : f32
    %175 = vector.broadcast %cst_63 : f32 to vector<32x1xf32>
    %176 = arith.divf %174, %175 : vector<32x1xf32>
    %177 = vector.broadcast %176 : vector<32x1xf32> to vector<32x128xf32>
    %178 = arith.subf %168, %177 : vector<32x128xf32>
    %179 = arith.mulf %178, %178 : vector<32x128xf32>
    %cst_64 = arith.constant dense<0.000000e+00> : vector<32xf32>
    %180 = vector.multi_reduction <add>, %179, %cst_64 [1] : vector<32x128xf32> to vector<32xf32>
    %181 = vector.shape_cast %180 : vector<32xf32> to vector<32x1xf32>
    %cst_65 = arith.constant 1.280000e+02 : f32
    %182 = vector.broadcast %cst_65 : f32 to vector<32x1xf32>
    %183 = arith.divf %181, %182 : vector<32x1xf32>
    %184 = vector.broadcast %176 : vector<32x1xf32> to vector<32x128xf32>
    %185 = arith.subf %168, %184 : vector<32x128xf32>
    %cst_66 = arith.constant 9.99999974E-6 : f32
    %186 = vector.broadcast %cst_66 : f32 to vector<32x1xf32>
    %187 = arith.addf %183, %186 : vector<32x1xf32>
    %188 = math.rsqrt %187 : vector<32x1xf32>
    %189 = vector.broadcast %188 : vector<32x1xf32> to vector<32x128xf32>
    %190 = arith.mulf %185, %189 : vector<32x128xf32>
    %191 = vector.broadcast %170 : vector<1x128xf32> to vector<32x128xf32>
    %192 = arith.mulf %190, %191 : vector<32x128xf32>
    %193 = vector.broadcast %172 : vector<1x128xf32> to vector<32x128xf32>
    %194 = arith.addf %192, %193 : vector<32x128xf32>
    %c0_67 = arith.constant 0 : index
    %c0_68 = arith.constant 0 : index
    %195 = vector.load %arg18[%c0_67, %c0_68] : memref<32x128xf32, #tpu.memory_space<vmem>>, vector<32x128xf32>
    tpu.vector_store %arg18[%c0_67, %c0_68], %194 {strides = array<i32>} : memref<32x128xf32, #tpu.memory_space<vmem>>, vector<32x128xf32>,
    %c1_i32 = arith.constant 1 : i32
    %196 = arith.cmpi eq, %arg1, %c1_i32 : i32
    %197 = arith.extui %196 : i1 to i32
    %c0_i32_69 = arith.constant 0 : i32
    %198 = arith.cmpi ne, %197, %c0_i32_69 : i32
    scf.if %198 {
      %c0_70 = arith.constant 0 : index
      %c0_71 = arith.constant 0 : index
      %199 = vector.load %arg15[%c0_70, %c0_71] : memref<128x384xbf16, #tpu.memory_space<vmem>>, vector<128x384xbf16>
      %200 = arith.truncf %194 : vector<32x128xf32> to vector<32x128xbf16>
      %cst_72 = arith.constant dense<0.000000e+00> : vector<32x384xf32>
      %201 = tpu.matmul %200, %199, %cst_72 {dimension_numbers = #tpu.dot_dimension_numbers<[1], [0], [0], [1], [0, 0, 1, 1], [], []>} : vector<32x128xbf16>, vector<128x384xbf16>, vector<32x384xf32> -> vector<32x384xf32>
      %c0_73 = arith.constant 0 : index
      %c0_74 = arith.constant 0 : index
      %202 = vector.load %arg16[%c0_73, %c0_74] : memref<1x384xf32, #tpu.memory_space<vmem>>, vector<1x384xf32>
      %203 = vector.broadcast %202 : vector<1x384xf32> to vector<32x384xf32>
      %204 = arith.addf %201, %203 : vector<32x384xf32>
      %c0_75 = arith.constant 0 : index
      %c0_76 = arith.constant 0 : index
      %205 = vector.load %arg17[%c0_75, %c0_76] : memref<32x384xf32, #tpu.memory_space<vmem>>, vector<32x384xf32>
      tpu.vector_store %arg17[%c0_75, %c0_76], %204 {strides = array<i32>} : memref<32x384xf32, #tpu.memory_space<vmem>>, vector<32x384xf32>,
    } else {
    }
    return
  }
  func.func @transform_0(%arg0: i32, %arg1: i32) -> (i32, i32) {
    %c0_i32 = arith.constant 0 : i32
    %c0_i32_0 = arith.constant 0 : i32
    return %arg0, %c0_i32 : i32, i32
  }
  func.func @transform_1(%arg0: i32, %arg1: i32) -> (i32, i32, i32) {
    %c0_i32 = arith.constant 0 : i32
    %c0_i32_0 = arith.constant 0 : i32
    %c0_i32_1 = arith.constant 0 : i32
    return %arg1, %c0_i32, %c0_i32_0 : i32, i32, i32
  }
  func.func @transform_2(%arg0: i32, %arg1: i32) -> (i32, i32, i32) {
    %c0_i32 = arith.constant 0 : i32
    %c0_i32_0 = arith.constant 0 : i32
    %c0_i32_1 = arith.constant 0 : i32
    return %arg1, %c0_i32, %c0_i32_0 : i32, i32, i32
  }
  func.func @transform_3(%arg0: i32, %arg1: i32) -> (i32, i32, i32) {
    %c0_i32 = arith.constant 0 : i32
    %c0_i32_0 = arith.constant 0 : i32
    %c0_i32_1 = arith.constant 0 : i32
    return %arg1, %c0_i32, %c0_i32_0 : i32, i32, i32
  }
  func.func @transform_4(%arg0: i32, %arg1: i32) -> (i32, i32, i32) {
    %c0_i32 = arith.constant 0 : i32
    %c0_i32_0 = arith.constant 0 : i32
    %c0_i32_1 = arith.constant 0 : i32
    return %arg1, %c0_i32, %c0_i32_0 : i32, i32, i32
  }
  func.func @transform_5(%arg0: i32, %arg1: i32) -> (i32, i32, i32) {
    %c0_i32 = arith.constant 0 : i32
    %c0_i32_0 = arith.constant 0 : i32
    %c0_i32_1 = arith.constant 0 : i32
    return %arg1, %c0_i32, %c0_i32_0 : i32, i32, i32
  }
  func.func @transform_6(%arg0: i32, %arg1: i32) -> (i32, i32, i32) {
    %c0_i32 = arith.constant 0 : i32
    %c0_i32_0 = arith.constant 0 : i32
    %c0_i32_1 = arith.constant 0 : i32
    return %arg1, %c0_i32, %c0_i32_0 : i32, i32, i32
  }
  func.func @transform_7(%arg0: i32, %arg1: i32) -> (i32, i32, i32) {
    %c0_i32 = arith.constant 0 : i32
    %c0_i32_0 = arith.constant 0 : i32
    %c0_i32_1 = arith.constant 0 : i32
    return %arg1, %c0_i32, %c0_i32_0 : i32, i32, i32
  }
  func.func @transform_8(%arg0: i32, %arg1: i32) -> (i32, i32, i32) {
    %c0_i32 = arith.constant 0 : i32
    %c0_i32_0 = arith.constant 0 : i32
    %c0_i32_1 = arith.constant 0 : i32
    return %arg1, %c0_i32, %c0_i32_0 : i32, i32, i32
  }
  func.func @transform_9(%arg0: i32, %arg1: i32) -> (i32, i32, i32) {
    %c0_i32 = arith.constant 0 : i32
    %c0_i32_0 = arith.constant 0 : i32
    %c0_i32_1 = arith.constant 0 : i32
    return %arg1, %c0_i32, %c0_i32_0 : i32, i32, i32
  }
  func.func @transform_10(%arg0: i32, %arg1: i32) -> (i32, i32, i32) {
    %c0_i32 = arith.constant 0 : i32
    %c0_i32_0 = arith.constant 0 : i32
    %c0_i32_1 = arith.constant 0 : i32
    return %arg1, %c0_i32, %c0_i32_0 : i32, i32, i32
  }
  func.func @transform_11(%arg0: i32, %arg1: i32) -> (i32, i32, i32) {
    %c0_i32 = arith.constant 0 : i32
    %c0_i32_0 = arith.constant 0 : i32
    %c0_i32_1 = arith.constant 0 : i32
    return %arg1, %c0_i32, %c0_i32_0 : i32, i32, i32
  }
  func.func @transform_12(%arg0: i32, %arg1: i32) -> (i32, i32, i32) {
    %c0_i32 = arith.constant 0 : i32
    %c0_i32_0 = arith.constant 0 : i32
    %c0_i32_1 = arith.constant 0 : i32
    return %arg1, %c0_i32, %c0_i32_0 : i32, i32, i32
  }
  func.func @transform_13(%arg0: i32, %arg1: i32) -> (i32, i32) {
    %c0_i32 = arith.constant 0 : i32
    %c0_i32_0 = arith.constant 0 : i32
    %c0_i32_1 = arith.constant 0 : i32
    return %c0_i32, %c0_i32_0 : i32, i32
  }
  func.func @transform_14(%arg0: i32, %arg1: i32) -> (i32, i32) {
    %c0_i32 = arith.constant 0 : i32
    %c0_i32_0 = arith.constant 0 : i32
    %c0_i32_1 = arith.constant 0 : i32
    return %c0_i32, %c0_i32_0 : i32, i32
  }
  func.func @transform_15(%arg0: i32, %arg1: i32) -> (i32, i32) {
    %c0_i32 = arith.constant 0 : i32
    %c0_i32_0 = arith.constant 0 : i32
    return %arg0, %c0_i32 : i32, i32
  }
}

</mosaic_0001>

<bundles_post_ra>
// kernel: masked_prosody_forward.1
= control target key start
LH: loop header
LB: loop body
LE: loop exit
PB: predicated region body
PF: predicated region fallthrough
CT: control target
= control target key end

     0   :  { %s5049_s0 = inlined_call_operand.vmem [shape: f32[32,128], index: 0, kind: input, shape index: {}]   ;;  %s5050_s1 = inlined_call_operand.vmem [shape: bf16[2,128,384], index: 1, kind: input, shape index: {}]   ;;  %s5051_s2 = inlined_call_operand.hbm [shape: f32[2,1,384], index: 2, kind: input, shape index: {}]   ;;  %s5052_s3 = inlined_call_operand.vmem [shape: bf16[2,128,128], index: 3, kind: input, shape index: {}]   ;;  %s5053_s4 = inlined_call_operand.hbm [shape: f32[2,1,128], index: 4, kind: input, shape index: {}]   ;;  %s5054_s5 = inlined_call_operand.hbm [shape: f32[2,1,128], index: 5, kind: input, shape index: {}]   ;;  %s5055_s6 = inlined_call_operand.hbm [shape: f32[2,1,128], index: 6, kind: input, shape index: {}]   ;;  %s5056_s7 = inlined_call_operand.vmem [shape: bf16[2,896,128], index: 7, kind: input, shape index: {}]   ;;  %s5057_s8 = inlined_call_operand.hbm [shape: f32[2,1,128], index: 8, kind: input, shape index: {}]   ;;  %s5058_s9 = inlined_call_operand.hbm [shape: bf16[2,128,128], index: 9, kind: input, shape index: {}]   ;;  %s5059_s10 = inlined_call_operand.hbm [shape: f32[2,1,128], index: 10, kind: input, shape index: {}]   ;;  %s5060_s11 = inlined_call_operand.hbm [shape: f32[2,1,128], index: 11, kind: input, shape index: {}]   ;;  %s5061_s12 = inlined_call_operand.hbm [shape: f32[2,1,128], index: 12, kind: input, shape index: {}]   ;;  %s5062_s13 = inlined_call_operand.hbm [shape: bf16[128,384], index: 13, kind: input, shape index: {}]   ;;  %s5063_s14 = inlined_call_operand.vmem [shape: f32[1,384], index: 14, kind: input, shape index: {}]   ;;  %s5064_s15 = inlined_call_operand.vmem [shape: f32[32,384], index: 15, kind: output, shape index: {}]  }
   0x1   :  { %5074 = sst [smem:[#allocation28_spill]] %s5049_s0 }
   0x2   :  { %5075 = sst [smem:[#allocation29_spill]] %s5050_s1 }
   0x3   :  { %5076 = sst [smem:[#allocation30_spill]] %s5051_s2 }
   0x4   :  { %5077 = sst [smem:[#allocation31_spill]] %s5053_s4 }
   0x5   :  { %5078 = sst [smem:[#allocation32_spill]] %s5055_s6 }
   0x6   :  { %5079 = sst [smem:[#allocation33_spill]] %s5056_s7 }
   0x7   :  { %5080 = sst [smem:[#allocation34_spill]] %s5058_s9 }
   0x8   :  { %5081 = sst [smem:[#allocation35_spill]] %s5060_s11 }
   0x9   :  { %5082 = sst [smem:[#allocation36_spill]] %s5062_s13 }
   0xa   :  { %5083 = sst [smem:[#allocation37_spill]] %s5063_s14 }
   0xb   :  { %5084 = sst [smem:[#allocation38_spill]] %s5064_s15 }
   0xc   :  { %20 = vsyncpa [#allocation4], 0 }
   0xd   :  { %22 = vsyncpa [#allocation4 + $0x1], 0 }
   0xe   :  { %23 = vsyncpa [#allocation6], 0 }
   0xf   :  { %25 = vsyncpa [#allocation6 + $0x1], 0 }
  0x10   :  { %26 = vsyncpa [#allocation9], 0 }
  0x11   :  { %28 = vsyncpa [#allocation9 + $0x1], 0 }
  0x12   :  { %29 = vsyncpa [#allocation12], 0 }
  0x13   :  { %31 = vsyncpa [#allocation12 + $0x1], 0 }
  0x14   :  { %32 = vsyncpa [#allocation15], 0 }
  0x15   :  { %34 = vsyncpa [#allocation15 + $0x1], 0 }
  0x16   :  { %35 = vsyncpa [#allocation18], 0  ;;  %s4338_s18 = smov 0   ;;  %s4340_s19 = smov 0  }
  0x17   :  { %s4342_s20 = smov 0   ;;  %s4344_s21 = smov 0  }
  0x18   :  { %s4346_s22 = smov 0   ;;  %s4348_s23 = smov 0  }
  0x19 LB: > { %5085 = sst [smem:[#allocation25_spill]] %s4237_s20  ;;  %s50_s24 = sadd.s32 1, %s4245_s22  ;;  %s4249_s23 = sphi %s4348_s23, %s41_s23   ;;  %s4245_s22 = sphi %s4346_s22, %s5124_s22   ;;  %s4241_s21 = sphi %s4344_s21, %s5123_s21   ;;  %s4237_s20 = sphi %s4342_s20, %s5119_s20   ;;  %s4233_s19 = sphi %s4340_s19, %s5122_s19   ;;  %s4229_s18 = sphi %s4338_s18, %s5121_s18  }
  0x1a   : > { %s112_s25 = sadd.s32 1, %s4237_s20  ;;  %p51_p0 = scmp.ge.s32.totalorder %s50_s24, 2 }
  0x1b   : > { %p119_p1 = scmp.ne.s32.totalorder %s4237_s20, %s4233_s19  ;;  %p120_p2 = scmp.eq.s32.totalorder %s4249_s23, 0 }
  0x1c   : > { %s5126_s24 = smov (%p51_p0, %s50_s24), 0  ;;  %p3765_p4 = scmp.lt.s32.totalorder %s4249_s23, 2 }
  0x1d   : > { %5086 = sst [smem:[#allocation26_spill]] %s5126_s24  ;;  %p121_p3 = por %p120_p2, %p119_p1 }
  0x1e   : > { %s109_s26 = ssub.s32 %s4245_s22, %s5126_s24  ;;  %s4379_s27 = sand.u32 1, %s4237_s20  }
  0x1f   : > { %p110_p5 = scmp.eq.s32.totalorder %s109_s26, 0  ;;  %p4381_p6 = pnand %p3765_p4, %p121_p3 }
  0x20   : > { %s4386_s29 = sand.u32 1, %s4249_s23   ;;  %s5089_s4 = sld [smem:[#allocation31_spill]] }
  0x21   : > { %s4389_s30 = scalar_select %p110_p5, %s4237_s20, %s112_s25  }
  0x22   : > { %s541_s26 = scalar_lea.vmem [#allocation5], %s4379_s27  ;;  %s5069_s0 = scalar_lea.sflag [#allocation6], %s4386_s29 }
  0x23   : > { %5088 = sst [smem:[#allocation27_spill]] %s4389_s30  ;;  %s548_s15 = sshll.u32 %s541_s26, 4  ;;  %s549_s15 = int_to_ptr.vmem [resolvable:$true] %s548_s15 }
  0x24   : > { %s5090_s6 = sld [smem:[#allocation32_spill]]  ;;  %s575_s17 = scalar_lea.vmem [#allocation8], %s4379_s27 }
  0x25   : > { %s582_s20 = sshll.u32 %s575_s17, 4  ;;  %s3061_s26 = sshll.u32 %s4379_s27, 6  ;;  %s583_s20 = int_to_ptr.vmem [resolvable:$true] %s582_s20 }
  0x26   : > { %s544_s24 = scalar_lea.hbm %s5089_s4, %s4245_s22  ;;  %s5091_s9 = sld [smem:[#allocation34_spill]] }
  0x27   : > { %s546_s14 = sshll.u32 %s544_s24, 4  ;;  %s5070_s24 = scalar_lea.sflag [#allocation9], %s4386_s29  ;;  %s547_s14 = int_to_ptr.hbm [resolvable:$true] %s546_s14 }
  0x28   : > { %3742 = dma.hbm_to_vmem [thread:$0]  (!%p4381_p6), %s547_s14, 16, %s549_s15, %s5069_s0  }
  0x29   : > { %s3567_s14 = sshll.u32 %s4245_s22, 6  ;;  %s5092_s11 = sld [smem:[#allocation35_spill]] }
  0x2a   : > { %s578_s30 = scalar_lea.hbm %s5090_s6, %s4245_s22  ;;  %s5072_s4 = scalar_lea.sflag [#allocation15], %s4386_s29 }
  0x2b   : > { %s580_s16 = sshll.u32 %s578_s30, 4  ;;  %s618_s30 = scalar_lea.vmem [#allocation11], %s3061_s26  ;;  %s581_s16 = int_to_ptr.hbm [resolvable:$true] %s580_s16 }
  0x2c   : > { %3748 = dma.hbm_to_vmem [thread:$0]  (!%p4381_p6), %s581_s16, 16, %s583_s20, %s5070_s24  }
  0x2d   : > { %s623_s7 = scalar_lea.hbm %s5091_s9, %s3567_s14  ;;  %s626_s25 = sshll.u32 %s618_s30, 4  ;;  %s627_s25 = int_to_ptr.vmem [resolvable:$true] %s626_s25 }
  0x2e   : > { %s624_s17 = sshll.u32 %s623_s7, 4  ;;  %s5073_s20 = scalar_lea.sflag [#allocation12], %s4386_s29  ;;  %s625_s17 = int_to_ptr.hbm [resolvable:$true] %s624_s17 }
  0x2f   : > { %s4251_s16 = smov 64   ;;  %s4252_s24 = smov 4  }
  0x30   : > { %3754 = dma.hbm_to_vmem [thread:$0]  (!%p4381_p6), %s625_s17, 1024, %s627_s25, %s5073_s20, %s4251_s16, %s4251_s16, %s4252_s24  }
  0x31   : > { %s659_s14 = scalar_lea.hbm %s5092_s11, %s4245_s22  ;;  %s656_s30 = scalar_lea.vmem [#allocation14], %s4379_s27 }
  0x32   : > { %s661_s15 = sshll.u32 %s659_s14, 4  ;;  %s663_s7 = sshll.u32 %s656_s30, 4  ;;  %s662_s15 = int_to_ptr.hbm [resolvable:$true] %s661_s15  ;;  %s664_s7 = int_to_ptr.vmem [resolvable:$true] %s663_s7 }
  0x33   : > { %3760 = dma.hbm_to_vmem [thread:$0]  (!%p4381_p6), %s662_s15, 16, %s664_s7, %s5072_s4  }
  0x34   : > { %s5071_s6 = sadd.s32 4294967295, %s4249_s23   ;;  %p125_p7 = scmp.ne.s32.totalorder %s4233_s19, %s4229_s18 }
  0x35   : > { %p4436_p8 = scmp.eq.s32.totalorder %s5071_s6, 0  ;;  %p3057_p9 = scmp.ge.s32.totalorder %s4249_s23, 1 }
  0x36   : > { %p464_p10 = scmp.lt.s32.totalorder %s4249_s23, 3  ;;  %s5095_s13 = sld [smem:[#allocation36_spill]] }
  0x37   : > { %p4444_p11 = por %p4436_p8, %p125_p7  ;;  %s4253_s26 = smov [#allocation17]  }
  0x38   : > { %p4451_p12 = pnand %p3057_p9, %p464_p10  ;;  %s486_s14 = sshll.u32 %s4253_s26, 4  ;;  %s487_s14 = int_to_ptr.vmem [resolvable:$true] %s486_s14 }
  0x39   : > { %s3705_s15 = smul.u32 3, %s4379_s27  ;;  %s4254_s7 = smov 192  }
  0x3a   : > { %p3732_p13 = pneg %p4451_p12  ;;  %s3706_s30 = smul.u32 3, %s4245_s22 }
  0x3b   : > { %s4255_s17 = smov 12   ;;  %s5097_s2 = sld [smem:[#allocation30_spill]] }
  0x3c   : > { %s484_s0 = sshll.u32 %s5095_s13, 4  ;;  %p3733_p0 = pnand %p3732_p13, %p4436_p8  ;;  %s485_s0 = int_to_ptr.hbm [resolvable:$true] %s484_s0 }
  0x3d   : > { %s515_s26 = scalar_lea.vmem [#allocation3], %s3705_s15  ;;  %s512_s11 = scalar_lea.sflag [#allocation4], %s4379_s27 }
  0x3e   : > { %3735 = dma.hbm_to_vmem [thread:$0]  (!%p3733_p0), %s485_s0, 3072, %s487_s14, [#allocation18], %s4254_s7, %s4254_s7, %s4255_s17  }
  0x3f   : > { %s523_s9 = sshll.u32 %s515_s26, 4  ;;  %s561_s0 = scalar_lea.hbm %s5054_s5, %s4245_s22  ;;  %s524_s9 = int_to_ptr.vmem [resolvable:$true] %s523_s9 }
  0x40   : > { %s558_s6 = scalar_lea.vmem [#allocation7], %s4379_s27  ;;  %s642_s26 = scalar_lea.hbm %s5059_s10, %s4245_s22 }
  0x41   : > { %s519_s4 = scalar_lea.hbm %s5097_s2, %s3706_s30  ;;  %s565_s14 = sshll.u32 %s558_s6, 4  ;;  %s566_s14 = int_to_ptr.vmem [resolvable:$true] %s565_s14 }
  0x42   : > { %s521_s20 = sshll.u32 %s519_s4, 4  ;;  %s563_s30 = sshll.u32 %s561_s0, 4  ;;  %s522_s20 = int_to_ptr.hbm [resolvable:$true] %s521_s20  ;;  %s564_s30 = int_to_ptr.hbm [resolvable:$true] %s563_s30 }
  0x43   : > { %3739 = dma.hbm_to_vmem [thread:$0]  (!%p4381_p6), %s522_s20, 48, %s524_s9, %s512_s11  }
  0x44   : > { %s5098_s4 = scalar_lea.sflag [#allocation6], %s4386_s29  ;;  %s603_s9 = scalar_lea.hbm %s5057_s8, %s4245_s22 }
  0x45   : > { %3745 = dma.hbm_to_vmem [thread:$0]  (!%p4381_p6), %s564_s30, 16, %s566_s14, %s5098_s4  }
  0x46   : > { %s600_s11 = scalar_lea.vmem [#allocation10], %s4379_s27  ;;  %s605_s13 = sshll.u32 %s603_s9, 4  ;;  %s606_s13 = int_to_ptr.hbm [resolvable:$true] %s605_s13 }
  0x47   : > { %s607_s1 = sshll.u32 %s600_s11, 4  ;;  %s5099_s20 = scalar_lea.sflag [#allocation9], %s4386_s29  ;;  %s608_s1 = int_to_ptr.vmem [resolvable:$true] %s607_s1 }
  0x48   : > { %3751 = dma.hbm_to_vmem [thread:$0]  (!%p4381_p6), %s606_s13, 16, %s608_s1, %s5099_s20  }
  0x49   : > { %s639_s0 = scalar_lea.vmem [#allocation13], %s4379_s27  ;;  %s644_s14 = sshll.u32 %s642_s26, 4  ;;  %s645_s14 = int_to_ptr.hbm [resolvable:$true] %s644_s14 }
  0x4a   : > { %s646_s6 = sshll.u32 %s639_s0, 4  ;;  %s5100_s30 = scalar_lea.sflag [#allocation12], %s4386_s29  ;;  %s647_s6 = int_to_ptr.vmem [resolvable:$true] %s646_s6 }
  0x4b   : > { %3757 = dma.hbm_to_vmem [thread:$0]  (!%p4381_p6), %s645_s14, 16, %s647_s6, %s5100_s30  }
  0x4c   : > { %s676_s7 = scalar_lea.hbm %s5061_s12, %s4245_s22  ;;  %s673_s9 = scalar_lea.vmem [#allocation16], %s4379_s27 }
  0x4d   : > { %s680_s11 = sshll.u32 %s673_s9, 4  ;;  %s678_s2 = sshll.u32 %s676_s7, 4  ;;  %s681_s11 = int_to_ptr.vmem [resolvable:$true] %s680_s11  ;;  %s679_s2 = int_to_ptr.hbm [resolvable:$true] %s678_s2 }
  0x4e   : > { %s5101_s1 = scalar_lea.sflag [#allocation15], %s4386_s29  ;;  %689 = sbr.rel (%p4451_p12) target bundleno = 2079 (0x81f), region = 80 }
  0x4f   : > { %3763 = dma.hbm_to_vmem [thread:$0]  (!%p4381_p6), %s679_s2, 16, %s681_s11, %s5101_s1  }
  0x50   : > { %s4506_s13 = sand.u32 (!%p4451_p12), 1, %s4233_s19  }
  0x51   : > { %s3707_s20 = smul.u32 (!%p4451_p12), 3, %s4506_s13  ;;  %s692_s17 = scalar_lea.sflag (!%p4451_p12), [#allocation4], %s4506_s13 }
  0x53   : > { %s4510_s16 = scalar_lea.vmem [#allocation3], %s3707_s20 }
  0x54   : > { %4204 = dma.done.wait (%p4444_p11), %s692_s17, 48  }
  0x55   : > { %4206 = vsyncadd (%p4444_p11), %s692_s17, 4294967248  ;;  %s5102_s2 = sadd.s32 4294967295, %s4249_s23  }
  0x56   : > { %s701_s27 = sand.u32 1, %s5102_s2  }
  0x57   : > { %s702_s28 = scalar_lea.sflag [#allocation6], %s701_s27 }
  0x58   : > { %4208 = dma.done.wait (%p4444_p11), %s702_s28, 32  }
  0x59   : > { %4210 = vsyncadd (%p4444_p11), %s702_s28, 4294967264  ;;  %s720_s26 = scalar_lea.sflag [#allocation9], %s701_s27 }
  0x5a   : > { %4212 = dma.done.wait (%p4444_p11), %s720_s26, 32  }
  0x5b   : > { %4214 = vsyncadd (%p4444_p11), %s720_s26, 4294967264  ;;  %s3065_s6 = sshll.u32 %s4506_s13, 6  ;;  %s738_s30 = scalar_lea.sflag [#allocation12], %s701_s27 }
  0x5c   : > { %s4531_s4 = scalar_lea.vmem [#allocation11], %s3065_s6 }
  0x5d   : > { %4216 = dma.done.wait (%p4444_p11), %s738_s30, 1040  }
  0x5e   : > { %4218 = vsyncadd (%p4444_p11), %s738_s30, 4294966256  ;;  %s757_s7 = scalar_lea.sflag [#allocation15], %s701_s27 }
  0x5f   : > { %4220 = dma.done.wait (%p4444_p11), %s757_s7, 32  }
  0x60   : > { %4222 = vsyncadd (%p4444_p11), %s757_s7, 4294967264 }
  0x61   : > { %4224 = dma.done.wait (%p4436_p8), [#allocation18], 3072  }
  0x62   : > { %4226 = vsyncadd (%p4436_p8), [#allocation18], 4294964224  ;;  %p881_p1 = scmp.lt.s32.totalorder %s4241_s21, 1  ;;  %s5103_s30 = sld [smem:[#allocation29_spill]] }
  0x63   : > { %s5104_s9 = sld [smem:[#allocation33_spill]]  ;;  %p3071_p2 = scmp.ne.s32.totalorder %s4241_s21, 0 }
  0x64   : > { %s882_s1 = scalar_select %p881_p1, %s4241_s21, 1 }
  0x65   : > { %907 = sbr.rel (%p3071_p2) target bundleno = 112 (0x70), region = 124  ;;  %s5105_s18 = sld [smem:[#allocation28_spill]] (!%p3071_p2) }
  0x66   : > { %s3708_s20 = smul.u32 192, %s882_s1  ;;  %s3568_s17 = sshll.u32 %s882_s1, 6 }
  0x67   : > { %s4553_s28 = scalar_lea.vmem %s5052_s3, %s3568_s17  ;;  %s3709_s25 = smul.u32 448, %s882_s1 }
  0x68   : > { %s4558_s7 = scalar_lea.vmem %s5103_s30, %s3708_s20 }
  0x69   : > { %s4563_s15 = scalar_lea.vmem %s5104_s9, %s3709_s25 }
  0x6b   : > { %s5106_s29 = smov %s5105_s18  ;;  %v908_v0 = vld [vmem:[%s5105_s18] sm:$0xff] }
  0x6c   : > { %v909_v1 = vld [vmem:[%s5106_s29 + $0x8] sm:$0xff]  ;;  %v910_v2 = vld [vmem:[%s5106_s29 + $0x10] sm:$0xff]  ;;  %912 = vst [vmem:[#allocation2 + $0x10] sm:$0xff] %v908_v0  ;;  %v911_v3 = vld [vmem:[%s5106_s29 + $0x18] sm:$0xff] }
  0x6d   : > { %913 = vst [vmem:[#allocation2] sm:$0xff] %v909_v1 }
  0x6e   : > { %914 = vst [vmem:[#allocation2 + $0x18] sm:$0xff] %v910_v2 }
  0x6f   : > { %915 = vst [vmem:[#allocation2 + $0x8] sm:$0xff] %v911_v3 }
  0x70 PF: > { %v3590_v4 = vld [vmem:[%s4558_s7 + $0xac] sm:$0xf]  ;;  %v3162_v5 = vld [vmem:[%s4558_s7 + $0xb4] sm:$0xf0]  ;;  %v3587_v6 = vld [vmem:[%s4558_s7 + $0x94] sm:$0xf]  ;;  %v920_v58 = vlaneseq }
  0x71   : > { %v3165_v7 = vor.u32 %v3590_v4, %v3162_v5  ;;  %v3150_v8 = vld [vmem:[%s4558_s7 + $0x9c] sm:$0xf0]  ;;  %v3160_v9 = vld [vmem:[%s4558_s7 + $0xa8] sm:$0xf]  ;;  %v3591_v10 = vld [vmem:[%s4558_s7 + $0xb0] sm:$0xf0] }
  0x72   : > { %v3153_v11 = vor.u32 %v3587_v6, %v3150_v8  ;;  %v3161_v12 = vor.u32 %v3591_v10, %v3160_v9  ;;  %v3148_v13 = vld [vmem:[%s4558_s7 + $0x90] sm:$0xf]  ;;  %v3588_v14 = vld [vmem:[%s4558_s7 + $0x98] sm:$0xf0]  ;;  %v3138_v16 = vld [vmem:[%s4558_s7 + $0x84] sm:$0xf0] }
  0x73   : > { %1121 = vmatpush.bf16.msra.mxu1 %v3165_v7  ;;  %v3584_v15 = vld [vmem:[%s4558_s7 + $0x7c] sm:$0xf]  ;;  %v3149_v17 = vor.u32 %v3588_v14, %v3148_v13  ;;  %v3136_v18 = vld [vmem:[%s4558_s7 + $0x78] sm:$0xf]  ;;  %v3585_v19 = vld [vmem:[%s4558_s7 + $0x80] sm:$0xf0] }
  0x74   : > { %1102 = vmatpush.bf16.msra.mxu0 %v3161_v12  ;;  %v3141_v20 = vor.u32 %v3584_v15, %v3138_v16  ;;  %v3581_v21 = vld [vmem:[%s4558_s7 + $0x64] sm:$0xf]  ;;  %v3126_v22 = vld [vmem:[%s4558_s7 + $0x6c] sm:$0xf0]  ;;  %v3137_v23 = vor.u32 %v3585_v19, %v3136_v18  ;;  %v3124_v24 = vld [vmem:[%s4558_s7 + $0x60] sm:$0xf] }
  0x75   : > { %v3582_v25 = vld [vmem:[%s4558_s7 + $0x68] sm:$0xf0]  ;;  %v3129_v26 = vor.u32 %v3581_v21, %v3126_v22  ;;  %v3114_v28 = vld [vmem:[%s4558_s7 + $0x54] sm:$0xf0]  ;;  %v3112_v30 = vld [vmem:[%s4558_s7 + $0x48] sm:$0xf] }
  0x76   : > { %v3578_v27 = vld [vmem:[%s4558_s7 + $0x4c] sm:$0xf]  ;;  %v3125_v29 = vor.u32 %v3582_v25, %v3124_v24  ;;  %v3579_v31 = vld [vmem:[%s4558_s7 + $0x50] sm:$0xf0]  ;;  %v3102_v34 = vld [vmem:[%s4558_s7 + $0x3c] sm:$0xf0] }
  0x77   : > { %1122 = vmatpush.bf16.msra.mxu1 %v3153_v11  ;;  %v3117_v32 = vor.u32 %v3578_v27, %v3114_v28  ;;  %v3575_v33 = vld [vmem:[%s4558_s7 + $0x34] sm:$0xf]  ;;  %v3113_v35 = vor.u32 %v3579_v31, %v3112_v30  ;;  %v3100_v36 = vld [vmem:[%s4558_s7 + $0x30] sm:$0xf]  ;;  %v3576_v37 = vld [vmem:[%s4558_s7 + $0x38] sm:$0xf0] }
  0x78   : > { %1103 = vmatpush.bf16.msra.mxu0 %v3149_v17  ;;  %v3105_v38 = vor.u32 %v3575_v33, %v3102_v34  ;;  %v3572_v39 = vld [vmem:[%s4558_s7 + $0x1c] sm:$0xf]  ;;  %v3090_v40 = vld [vmem:[%s4558_s7 + $0x24] sm:$0xf0]  ;;  %v3101_v41 = vor.u32 %v3576_v37, %v3100_v36  ;;  %v3088_v42 = vld [vmem:[%s4558_s7 + $0x18] sm:$0xf] }
  0x79   : > { %v3573_v43 = vld [vmem:[%s4558_s7 + $0x20] sm:$0xf0]  ;;  %v3093_v44 = vor.u32 %v3572_v39, %v3090_v40  ;;  %v3078_v46 = vld [vmem:[%s4558_s7 + $0xc] sm:$0xf0]  ;;  %v3076_v48 = vld [vmem:[%s4558_s7] sm:$0xf] }
  0x7a   : > { %v3569_v45 = vld [vmem:[%s4558_s7 + $0x4] sm:$0xf]  ;;  %v3089_v47 = vor.u32 %v3573_v43, %v3088_v42  ;;  %v3570_v49 = vld [vmem:[%s4558_s7 + $0x8] sm:$0xf0]  ;;  %v4610_v51 = vld [vmem:[#allocation2 + $0x10] sm:$0xff]  ;;  %v921_v60 = vand.u32 127, %v920_v58 }
  0x7b   : > { %1123 = vmatpush.bf16.msra.mxu1 %v3141_v20  ;;  %v3081_v50 = vor.u32 %v3569_v45, %v3078_v46  ;;  %v4612_v52 = vld [vmem:[#allocation2] sm:$0xff]  ;;  %v3077_v53 = vor.u32 %v3570_v49, %v3076_v48  ;;  %v4620_v55 = vld [vmem:[#allocation2 + $0x18] sm:$0xff]  ;;  %v4622_v56 = vld [vmem:[#allocation2 + $0x8] sm:$0xff]  ;;  %v4256_v2 = vmov 0.0   ;;  %vm1196_vm2 = vcmask 130048   ;;  %s5108_s18 = scalar_lea.vmem [#allocation7], %s4506_s13 }
  0x7c   : > { %1104 = vmatpush.bf16.msra.mxu0 %v3137_v23  ;;  %v4616_v54 = vpack.c.bf16 %v4612_v52, %v4610_v51  ;;  %v4626_v57 = vpack.c.bf16 %v4622_v56, %v4620_v55  ;;  %v4631_v61 = vld [vmem:[%s4510_s16] sm:$0x7]  ;;  %vm923_vm0 = vcmp.lt.s32.totalorder %v921_v60, 64  ;;  %vm927_vm1 = vcmp.ge.s32.totalorder %v921_v60, 64  ;;  %v3168_v36 = vld [vmem:[%s4558_s7 + $0xb0] sm:$0xf] }
  0x7d   : > { %v968_v62 = vperm.slane %v4631_v61, 0  ;;  %v969_v1 = vperm.slane %v4631_v61, 1  ;;  %v4635_v3 = vsel %vm923_vm0, 1.0, %v4256_v2  ;;  %v4639_v18 = vsel %vm927_vm1, 1.0, %v4256_v2  ;;  %v3592_v37 = vld [vmem:[%s4558_s7 + $0xb8] sm:$0xf0] }
  0x7e   : > { %v3169_v39 = vor.u32 %v3592_v37, %v3168_v36  ;;  %v3589_v40 = vld [vmem:[%s4558_s7 + $0xa0] sm:$0xf0]  ;;  %v3144_v43 = vld [vmem:[%s4558_s7 + $0x80] sm:$0xf]  ;;  %v3132_v48 = vld [vmem:[%s4558_s7 + $0x68] sm:$0xf] }
  0x7f   : > { %1124 = vmatpush.bf16.msra.mxu1 %v3129_v26  ;;  %v3583_v49 = vld [vmem:[%s4558_s7 + $0x70] sm:$0xf0]  ;;  %v3120_v58 = vld [vmem:[%s4558_s7 + $0x50] sm:$0xf]  ;;  %s5107_s16 = scalar_lea.vmem [#allocation5], %s4506_s13  ;;  %s5109_s0 = scalar_lea.vmem [#allocation8], %s4506_s13 }
  0x80   : > { %1105 = vmatpush.bf16.msra.mxu0 %v3125_v29  ;;  %1140 = vmatpush.bf16.msra.mxu2 %v3169_v39  ;;  %vm1634_vm13 = vcmask 1041408   ;;  %vm1635_vm14 = vsmask.f32 1280  ;;  %s5112_s14 = scalar_lea.vmem [#allocation10], %s4506_s13  ;;  %s5115_s9 = scalar_lea.vmem [#allocation16], %s4506_s13 }
  0x81   : > { %vm4848_vm1 = vmand %vm1634_vm13, %vm1635_vm14  ;;  %p3466_p3 = scmp.ne.s32.totalorder %s4241_s21, 1 }
  0x82   : > { %s5117_s6 = sld [smem:[#allocation38_spill]] (!%p3466_p3) }
  0x83   : > { %1125 = vmatpush.bf16.msra.mxu1 %v3117_v32 }
  0x84   : > { %1106 = vmatpush.bf16.msra.mxu0 %v3113_v35 }
  0x87   : > { %1126 = vmatpush.bf16.msra.mxu1 %v3105_v38  ;;  %v3156_v38 = vld [vmem:[%s4558_s7 + $0x98] sm:$0xf] }
  0x88   : > { %1107 = vmatpush.bf16.msra.mxu0 %v3101_v41  ;;  %v3157_v41 = vor.u32 %v3589_v40, %v3156_v38 }
  0x8a   : > { %1141 = vmatpush.bf16.msra.mxu2 %v3157_v41 }
  0x8b   : > { %1127 = vmatpush.bf16.msra.mxu1 %v3093_v44  ;;  %v3586_v44 = vld [vmem:[%s4558_s7 + $0x88] sm:$0xf0] }
  0x8c   : > { %1108 = vmatpush.bf16.msra.mxu0 %v3089_v47  ;;  %v3145_v47 = vor.u32 %v3586_v44, %v3144_v43 }
  0x8e   : > { %1142 = vmatpush.bf16.msra.mxu2 %v3145_v47 }
  0x8f   : > { %1128 = vmatpush.bf16.msra.mxu1 %v3081_v50  ;;  %v3133_v50 = vor.u32 %v3583_v49, %v3132_v48 }
  0x90   : > { %1109 = vmatpush.bf16.msra.mxu0 %v3077_v53 }
  0x92   : > { %1129 = vmatmul.bf16.vlgmr.msra.gmra.mxu1 %v4616_v54  ;;  %1143 = vmatpush.bf16.msra.mxu2 %v3133_v50 }
  0x93   : > { %1110 = vmatmul.bf16.vlgmr.msra.gmra.mxu0 %v4616_v54 }
  0xa2   : > { %1134 = vmatmul.bf16.gmra.mxu1 %v4626_v57 }
  0xa3   : > { %1115 = vmatmul.bf16.gmra.mxu0 %v4626_v57 }
 0x10f   : > { %v1130_v59 = vpop.f32.mrf.mxu1 }
 0x110   : > { %v1111_v63 = vpop.f32.mrf.mxu0  ;;  %v1131_v8 = vadd.f32 %v1130_v59, %v969_v1  ;;  %v3580_v59 = vld [vmem:[%s4558_s7 + $0x58] sm:$0xf0] }
 0x111   : > { %v1112_v0 = vadd.f32 %v1111_v63, %v968_v62  ;;  %v3121_v63 = vor.u32 %v3580_v59, %v3120_v58 }
 0x113   : > { %v1159_v6 = vmul.f32 %v4635_v3, %v1112_v0  ;;  %v1161_v22 = vmul.f32 %v4639_v18, %v1112_v0  ;;  %v3108_v0 = vld [vmem:[%s4558_s7 + $0x38] sm:$0xf]  ;;  %1144 = vmatpush.bf16.msra.mxu2 %v3121_v63 }
 0x115   : > { %v1163_v9 = vmul.f32 0.125, %v1159_v6  ;;  %v1165_v25 = vmul.f32 0.125, %v1161_v22  ;;  %v3096_v6 = vld [vmem:[%s4558_s7 + $0x20] sm:$0xf] }
 0x117   : > { %v1132_v4 = vpop.f32.mrf.mxu1 }
 0x118   : > { %v1133_v5 = vadd.f32 %v1132_v4, %v969_v1  ;;  %v1113_v7 = vpop.f32.mrf.mxu0 }
 0x119   : > { %v1114_v11 = vadd.f32 %v1113_v7, %v968_v62  ;;  %v3574_v7 = vld [vmem:[%s4558_s7 + $0x28] sm:$0xf0] }
 0x11a   : > { %1181 = vmatpush.xpose.msra.mxu3 %v1133_v5 }
 0x11b   : > { %v1160_v13 = vmul.f32 %v4635_v3, %v1114_v11  ;;  %v1162_v27 = vmul.f32 %v4639_v18, %v1114_v11  ;;  %v3097_v11 = vor.u32 %v3574_v7, %v3096_v6 }
 0x11d   : > { %v1164_v16 = vmul.f32 0.125, %v1160_v13  ;;  %v1166_v29 = vmul.f32 0.125, %v1162_v27  ;;  %v3571_v13 = vld [vmem:[%s4558_s7 + $0x10] sm:$0xf0] }
 0x11e   : > { %1182 = vmatpush.xpose.msra.mxu3 %v1131_v8 }
 0x11f   : > { %v1135_v10 = vpop.f32.mrf.mxu1 }
 0x120   : > { %v1116_v12 = vpop.f32.mrf.mxu0  ;;  %v1136_v20 = vadd.f32 %v1135_v10, %v969_v1 }
 0x121   : > { %1183 = vmatmul.f32.vlgmr.msra.gmra.mxu3 %v1163_v9  ;;  %v1117_v14 = vadd.f32 %v1116_v12, %v968_v62  ;;  %v3084_v12 = vld [vmem:[%s4558_s7 + $0x8] sm:$0xf] }
 0x123   : > { %v1290_v19 = vmul.f32 %v4635_v3, %v1117_v14  ;;  %v1292_v30 = vmul.f32 %v4639_v18, %v1117_v14  ;;  %v3085_v14 = vor.u32 %v3571_v13, %v3084_v12 }
 0x125   : > { %v1294_v23 = vmul.f32 0.125, %v1290_v19  ;;  %v1296_v31 = vmul.f32 0.125, %v1292_v30 }
 0x127   : > { %v1137_v15 = vpop.f32.mrf.mxu1 }
 0x128   : > { %v1138_v17 = vadd.f32 %v1137_v15, %v969_v1  ;;  %v1118_v21 = vpop.f32.mrf.mxu0  ;;  %v3577_v1 = vld [vmem:[%s4558_s7 + $0x40] sm:$0xf0] }
 0x129   : > { %1186 = vmatmul.f32.gmra.mxu3 %v1164_v16  ;;  %v1119_v24 = vadd.f32 %v1118_v21, %v968_v62  ;;  %v3109_v4 = vor.u32 %v3577_v1, %v3108_v0  ;;  %v970_v1 = vperm.slane %v4631_v61, 2 }
 0x12a   : > { %1312 = vmatpush.xpose.msrb.mxu0 %v1138_v17 }
 0x12b   : > { %v1291_v26 = vmul.f32 %v4635_v3, %v1119_v24  ;;  %v1293_v32 = vmul.f32 %v4639_v18, %v1119_v24  ;;  %1145 = vmatpush.bf16.msra.mxu2 %v3109_v4 }
 0x12d   : > { %v1295_v28 = vmul.f32 0.125, %v1291_v26  ;;  %v1297_v33 = vmul.f32 0.125, %v1293_v32 }
 0x12e   : > { %1313 = vmatpush.xpose.msrb.mxu0 %v1136_v20 }
 0x12f   : > { %1146 = vmatpush.bf16.msra.mxu2 %v3097_v11 }
 0x131   : > { %1189 = vmatmul.f32.gmra.mxu3 %v1165_v25  ;;  %1314 = vmatmul.f32.vlgmr.msrb.gmra.mxu0 %v1294_v23 }
 0x133   : > { %1147 = vmatpush.bf16.msra.mxu2 %v3085_v14 }
 0x136   : > { %1148 = vmatmul.bf16.vlgmr.msra.gmra.mxu2 %v4616_v54 }
 0x139   : > { %1192 = vmatmul.f32.gmra.mxu3 %v1166_v29  ;;  %1317 = vmatmul.f32.gmra.mxu0 %v1295_v28 }
 0x141   : > { %1320 = vmatmul.f32.gmra.mxu0 %v1296_v31 }
 0x146   : > { %1153 = vmatmul.bf16.gmra.mxu2 %v4626_v57 }
 0x149   : > { %1323 = vmatmul.f32.gmra.mxu0 %v1297_v33 }
 0x1a4   : > { %v1184_v34 = vpop.f32.mrf.mxu3 }
 0x1a5   : > { %v1197_v35 = vsel %vm1196_vm2, %v1184_v34, -inf }
 0x1a6   : > { %1198 = vmax.xlane.f32.xlu0 %v1197_v35 }
 0x1ac   : > { %v1187_v42 = vpop.f32.mrf.mxu3 }
 0x1ad   : > { %v1200_v45 = vsel %vm1196_vm2, %v1187_v42, -inf }
 0x1ae   : > { %v4655_v46 = vpop.f32.mrf.mxu0  ;;  %1201 = vmax.xlane.f32.xlu0 %v1200_v45 }
 0x1af   : > { %v1327_v2 = vsel %vm1196_vm2, %v4655_v46, -inf }
 0x1b4   : > { %v1190_v53 = vpop.f32.mrf.mxu3 }
 0x1b5   : > { %v1203_v60 = vsel %vm1196_vm2, %v1190_v53, -inf }
 0x1b6   : > { %v4662_v62 = vpop.f32.mrf.mxu0  ;;  %1204 = vmax.xlane.f32.xlu1 %v1203_v60 }
 0x1b7   : > { %v1330_v15 = vsel %vm1196_vm2, %v4662_v62, -inf }
 0x1b9   : > { %v1149_v0 = vpop.f32.mrf.mxu2 }
 0x1ba   : > { %v1150_v4 = vadd.f32 %v1149_v0, %v970_v1 }
 0x1bc   : > { %v1193_v5 = vpop.f32.mrf.mxu3 }
 0x1bd   : > { %v1206_v8 = vsel %vm1196_vm2, %v1193_v5, -inf }
 0x1be   : > { %v1321_v9 = vpop.f32.mrf.mxu0  ;;  %1328 = vmax.xlane.f32.xlu1 %v1327_v2  ;;  %1207 = vmax.xlane.f32.xlu2 %v1206_v8 }
 0x1bf   : > { %v1333_v10 = vsel %vm1196_vm2, %v1321_v9, -inf }
 0x1c0   : > { %1334 = vmax.xlane.f32.xlu0 %v1333_v10 }
 0x1c1   : > { %v1151_v2 = vpop.f32.mrf.mxu2 }
 0x1c6   : > { %v1324_v16 = vpop.f32.mrf.mxu0  ;;  %1331 = vmax.xlane.f32.xlu2 %v1330_v15 }
 0x1c7   : > { %v1336_v17 = vsel %vm1196_vm2, %v1324_v16, -inf }
 0x1c8   : > { %1337 = vmax.xlane.f32.xlu1 %v1336_v17 }
 0x1c9   : > { %v1154_v6 = vpop.f32.mrf.mxu2 }
 0x1ca   : > { %v1155_v8 = vadd.f32 %v1154_v6, %v970_v1  ;;  %v3822_v6 = vld [vmem:[%s5107_s16] ss:$0 sm:$0xff] }
 0x1d1   : > { %v1156_v7 = vpop.f32.mrf.mxu2 }
 0x219   : > { %v1199_v19 = vpop.xlane.xlu0 %1198 }
 0x21a   : > { %v1209_v20 = vsub.f32 %v1184_v34, %v1199_v19 }
 0x21c   : > { %v1213_v21 = vmul.f32 1.442695, %v1209_v20 }
 0x21e   : > { %3829 = vpow2.f32 %v1213_v21 }
 0x221   : > { %v1202_v22 = vpop.xlane.xlu0 %1201 }
 0x222   : > { %v1210_v23 = vsub.f32 %v1187_v42, %v1202_v22 }
 0x224   : > { %v4679_v24 = vpop.eup %3829  ;;  %v1215_v25 = vmul.f32 1.442695, %v1210_v23 }
 0x225   : > { %v1221_v26 = vsel %vm1196_vm2, %v4679_v24, 0.0 }
 0x226   : > { %3831 = vpow2.f32 %v1215_v25  ;;  %1222 = vadd.xlane.f32.xlu2 %v1221_v26 }
 0x229   : > { %v1205_v27 = vpop.xlane.xlu1 %1204 }
 0x22a   : > { %v1211_v28 = vsub.f32 %v1190_v53, %v1205_v27 }
 0x22c   : > { %v4683_v29 = vpop.eup %3831  ;;  %v1217_v54 = vmul.f32 1.442695, %v1211_v28 }
 0x22d   : > { %v1224_v57 = vsel %vm1196_vm2, %v4683_v29, 0.0 }
 0x22e   : > { %3833 = vpow2.f32 %v1217_v54  ;;  %1225 = vadd.xlane.f32.xlu0 %v1224_v57 }
 0x231   : > { %v1329_v30 = vpop.xlane.xlu1 %1328  ;;  %v1208_v31 = vpop.xlane.xlu2 %1207 }
 0x232   : > { %v1339_v32 = vsub.f32 %v4655_v46, %v1329_v30  ;;  %v1212_v33 = vsub.f32 %v1193_v5, %v1208_v31  ;;  %v1152_v5 = vadd.f32 %v1151_v2, %v970_v1 }
 0x233   : > { %v1335_v34 = vpop.xlane.xlu0 %1334 }
 0x234   : > { %v3834_v35 = vpop.eup %3833  ;;  %v1343_v36 = vmul.f32 1.442695, %v1339_v32  ;;  %v1219_v37 = vmul.f32 1.442695, %v1212_v33  ;;  %v1341_v38 = vsub.f32 %v1321_v9, %v1335_v34  ;;  %1267 = vmatpush.msrb.mxu3 %v1152_v5  ;;  %v1157_v9 = vadd.f32 %v1156_v7, %v970_v1  ;;  %v3600_v32 = vld [vmem:[%s4553_s28 + $0x38] sm:$0xff]  ;;  %v3599_v33 = vld [vmem:[%s4553_s28 + $0x30] sm:$0xff] }
 0x235   : > { %v1227_v39 = vsel %vm1196_vm2, %v3834_v35, 0.0  ;;  %1490 = vmatpush.bf16.msrb.mxu2 %v3600_v32  ;;  %v3598_v34 = vld [vmem:[%s4553_s28 + $0x28] sm:$0xff] }
 0x236   : > { %3835 = vpow2.f32 %v1343_v36  ;;  %1228 = vadd.xlane.f32.xlu1 %v1227_v39  ;;  %v1347_v40 = vmul.f32 1.442695, %v1341_v38  ;;  %1268 = vmatpush.msrb.mxu3 %v1150_v4  ;;  %v3596_v36 = vld [vmem:[%s4553_s28 + $0x18] sm:$0xff]  ;;  %v3594_v38 = vld [vmem:[%s4553_s28 + $0x8] sm:$0xff]  ;;  %v3593_v39 = vld [vmem:[%s4553_s28] sm:$0xff] }
 0x237   : > { %3837 = vpow2.f32 %v1219_v37  ;;  %1397 = vmatpush.msrb.mxu1 %v1157_v9  ;;  %v3595_v37 = vld [vmem:[%s4553_s28 + $0x10] sm:$0xff] }
 0x238   : > { %3839 = vpow2.f32 %v1347_v40 }
 0x239   : > { %v1332_v41 = vpop.xlane.xlu2 %1331  ;;  %1398 = vmatpush.msrb.mxu1 %v1155_v8  ;;  %1491 = vmatpush.bf16.msrb.mxu2 %v3599_v33 }
 0x23a   : > { %v1340_v42 = vsub.f32 %v4662_v62, %v1332_v41 }
 0x23b   : > { %v1338_v43 = vpop.xlane.xlu1 %1337 }
 0x23c   : > { %v3836_v44 = vpop.eup %3835  ;;  %v1345_v45 = vmul.f32 1.442695, %v1340_v42  ;;  %v1342_v46 = vsub.f32 %v1324_v16, %v1338_v43 }
 0x23d   : > { %v3838_v47 = vpop.eup %3837  ;;  %v1351_v48 = vsel %vm1196_vm2, %v3836_v44, 0.0  ;;  %1492 = vmatpush.bf16.msrb.mxu2 %v3598_v34  ;;  %v3608_v34 = vld [vmem:[%s4563_s15 + $0x38] sm:$0xff] }
 0x23e   : > { %3841 = vpow2.f32 %v1345_v45  ;;  %v1349_v49 = vmul.f32 1.442695, %v1342_v46  ;;  %1352 = vadd.xlane.f32.xlu2 %v1351_v48  ;;  %v1230_v50 = vsel %vm1196_vm2, %v3838_v47, 0.0  ;;  %v3840_v53 = vpop.eup %3839  ;;  %2203 = vmatpush.bf16.msra.mxu3 %v3608_v34 }
 0x23f   : > { %1231 = vadd.xlane.f32.xlu0 %v1230_v50  ;;  %v1357_v59 = vsel %vm1196_vm2, %v3840_v53, 0.0 }
 0x240   : > { %3843 = vpow2.f32 %v1349_v49 }
 0x244   : > { %v3842_v58 = vpop.eup %3841 }
 0x245   : > { %v1354_v60 = vsel %vm1196_vm2, %v3842_v58, 0.0 }
 0x246   : > { %v3844_v62 = vpop.eup %3843  ;;  %1358 = vadd.xlane.f32.xlu2 %v1357_v59  ;;  %1355 = vadd.xlane.f32.xlu1 %v1354_v60 }
 0x247   : > { %v1360_v63 = vsel %vm1196_vm2, %v3844_v62, 0.0 }
 0x248   : > { %1361 = vadd.xlane.f32.xlu0 %v1360_v63 }
 0x299   : > { %v1223_v10 = vpop.xlane.xlu2 %1222 }
 0x29a   : > { %3845 = vrcp.f32 %v1223_v10 }
 0x2a0   : > { %v3846_v11 = vpop.eup %3845 }
 0x2a1   : > { %v1226_v12 = vpop.xlane.xlu0 %1225  ;;  %v1237_v13 = vmul.f32 %v3846_v11, %v4679_v24 }
 0x2a2   : > { %3847 = vrcp.f32 %v1226_v12 }
 0x2a3   : > { %3170 = vmatmul.msk.f32.vlgmr.msrb.gmra.mxu3 %vm1196_vm2, %v1237_v13 }
 0x2a8   : > { %v3848_v61 = vpop.eup %3847 }
 0x2a9   : > { %v1229_v14 = vpop.xlane.xlu1 %1228  ;;  %v1238_v15 = vmul.f32 %v3848_v61, %v4683_v29 }
 0x2aa   : > { %3849 = vrcp.f32 %v1229_v14 }
 0x2ab   : > { %3171 = vmatmul.msk.f32.gmra.mxu3 %vm1196_vm2, %v1238_v15 }
 0x2b0   : > { %v3850_v16 = vpop.eup %3849 }
 0x2b1   : > { %v1353_v17 = vpop.xlane.xlu2 %1352  ;;  %v1239_v19 = vmul.f32 %v3850_v16, %v3834_v35  ;;  %v3597_v35 = vld [vmem:[%s4553_s28 + $0x20] sm:$0xff]  ;;  %v4257_v16 = vmov 128.0   ;;  %s5116_s28 = sld [smem:[#allocation37_spill]] (!%p3466_p3) }
 0x2b2   : > { %v1232_v20 = vpop.xlane.xlu0 %1231  ;;  %3851 = vrcp.f32 %v1353_v17  ;;  %1493 = vmatpush.bf16.msrb.mxu2 %v3597_v35  ;;  %v3624_v35 = vld [vmem:[%s4563_s15 + $0xb8] sm:$0xff] }
 0x2b3   : > { %3853 = vrcp.f32 %v1232_v20  ;;  %3172 = vmatmul.msk.f32.gmra.mxu3 %vm1196_vm2, %v1239_v19  ;;  %2241 = vmatpush.bf16.msra.mxu1 %v3624_v35 }
 0x2b6   : > { %1494 = vmatpush.bf16.msrb.mxu2 %v3596_v36  ;;  %v3607_v36 = vld [vmem:[%s4563_s15 + $0x30] sm:$0xff] }
 0x2b7   : > { %2204 = vmatpush.bf16.msra.mxu3 %v3607_v36 }
 0x2b8   : > { %v3852_v21 = vpop.eup %3851 }
 0x2b9   : > { %v3854_v22 = vpop.eup %3853  ;;  %v1356_v23 = vpop.xlane.xlu1 %1355  ;;  %v1367_v24 = vmul.f32 %v3852_v21, %v3836_v44 }
 0x2ba   : > { %3855 = vrcp.f32 %v1356_v23  ;;  %v1240_v25 = vmul.f32 %v3854_v22, %v3838_v47  ;;  %v1359_v26 = vpop.xlane.xlu2 %1358  ;;  %1495 = vmatpush.bf16.msrb.mxu2 %v3595_v37  ;;  %v3616_v37 = vld [vmem:[%s4563_s15 + $0x78] sm:$0xff] }
 0x2bb   : > { %3174 = vmatmul.msk.f32.vlgmr.msrb.gmra.mxu1 %vm1196_vm2, %v1367_v24  ;;  %3857 = vrcp.f32 %v1359_v26  ;;  %v1362_v29 = vpop.xlane.xlu0 %1361  ;;  %2222 = vmatpush.bf16.msra.mxu0 %v3616_v37  ;;  %v4800_v37 = vld [vmem:[%s4563_s15 + $0x178] sm:$0xff] }
 0x2bc   : > { %3173 = vmatmul.msk.f32.gmra.mxu3 %vm1196_vm2, %v1240_v25  ;;  %3859 = vrcp.f32 %v1362_v29 }
 0x2bd   : > { %3861 = vrcp.f32 %v4257_v16 }
 0x2be   : > { %1496 = vmatpush.bf16.msrb.mxu2 %v3594_v38  ;;  %v3623_v38 = vld [vmem:[%s4563_s15 + $0xb0] sm:$0xff] }
 0x2bf   : > { %2242 = vmatpush.bf16.msra.mxu1 %v3623_v38  ;;  %v3638_v38 = vld [vmem:[%s4563_s15 + $0x128] sm:$0xff] }
 0x2c0   : > { %v3856_v27 = vpop.eup %3855 }
 0x2c1   : > { %v1368_v28 = vmul.f32 %v3856_v27, %v3842_v58  ;;  %v3858_v54 = vpop.eup %3857 }
 0x2c2   : > { %v1369_v57 = vmul.f32 %v3858_v54, %v3840_v53  ;;  %v3860_v30 = vpop.eup %3859  ;;  %1497 = vmatpush.bf16.msrb.mxu2 %v3593_v39  ;;  %v3632_v39 = vld [vmem:[%s4563_s15 + $0xf8] sm:$0xff] }
 0x2c3   : > { %3175 = vmatmul.msk.f32.gmra.mxu1 %vm1196_vm2, %v1368_v28  ;;  %v1370_v31 = vmul.f32 %v3860_v30, %v3844_v62  ;;  %v3862_v17 = vpop.eup %3861 }
 0x2c4   : > { %vm1528_vm3 = vweird.f32 %v3862_v17 }
 0x2c6   : > { %2260 = vmatpush.bf16.msra.mxu2 %v3632_v39 }
 0x2cb   : > { %3176 = vmatmul.msk.f32.gmra.mxu1 %vm1196_vm2, %v1369_v57 }
 0x2d3   : > { %3177 = vmatmul.msk.f32.gmra.mxu1 %vm1196_vm2, %v1370_v31 }
 0x326   : > { %v1270_v40 = vpop.f32.mrf.mxu3 }
 0x327   : > { %v1282_v46 = vmul.f32 %v4635_v3, %v1270_v40  ;;  %v3606_v40 = vld [vmem:[%s4563_s15 + $0x28] sm:$0xff] }
 0x328   : > { %2205 = vmatpush.bf16.msra.mxu3 %v3606_v40 }
 0x32e   : > { %v1273_v41 = vpop.f32.mrf.mxu3 }
 0x32f   : > { %v1283_v47 = vmul.f32 %v4635_v3, %v1273_v41  ;;  %v3615_v41 = vld [vmem:[%s4563_s15 + $0x70] sm:$0xff] }
 0x330   : > { %2223 = vmatpush.bf16.msra.mxu0 %v3615_v41 }
 0x336   : > { %v1276_v42 = vpop.f32.mrf.mxu3 }
 0x337   : > { %v1286_v44 = vmul.f32 %v4639_v18, %v1276_v42  ;;  %v3622_v42 = vld [vmem:[%s4563_s15 + $0xa8] sm:$0xff] }
 0x338   : > { %v1400_v43 = vpop.f32.mrf.mxu1  ;;  %2243 = vmatpush.bf16.msra.mxu1 %v3622_v42 }
 0x339   : > { %v1288_v50 = vadd.f32 %v1286_v44, %v1282_v46  ;;  %v1412_v63 = vmul.f32 %v4635_v3, %v1400_v43  ;;  %v3631_v43 = vld [vmem:[%s4563_s15 + $0xf0] sm:$0xff]  ;;  %v3605_v44 = vld [vmem:[%s4563_s15 + $0x20] sm:$0xff]  ;;  %v3614_v46 = vld [vmem:[%s4563_s15 + $0x68] sm:$0xff] }
 0x33a   : > { %2261 = vmatpush.bf16.msra.mxu2 %v3631_v43  ;;  %2206 = vmatpush.bf16.msra.mxu3 %v3605_v44  ;;  %v4808_v43 = vld [vmem:[%s4563_s15 + $0x170] sm:$0xff]  ;;  %v3654_v44 = vld [vmem:[%s4563_s15 + $0x1a8] sm:$0xff] }
 0x33b   : > { %2224 = vmatpush.bf16.msra.mxu0 %v3614_v46 }
 0x33f   : > { %v1279_v45 = vpop.f32.mrf.mxu3 }
 0x340   : > { %v1287_v48 = vmul.f32 %v4639_v18, %v1279_v45  ;;  %v1403_v49 = vpop.f32.mrf.mxu1 }
 0x341   : > { %v1413_v0 = vmul.f32 %v4635_v3, %v1403_v49 }
 0x342   : > { %v1289_v53 = vadd.f32 %v1287_v48, %v1283_v47  ;;  %v3621_v47 = vld [vmem:[%s4563_s15 + $0xa0] sm:$0xff]  ;;  %v3630_v48 = vld [vmem:[%s4563_s15 + $0xe8] sm:$0xff] }
 0x343   : > { %2244 = vmatpush.bf16.msra.mxu1 %v3621_v47  ;;  %2262 = vmatpush.bf16.msra.mxu2 %v3630_v48 }
 0x344   : > { %v1436_v58 = vpack.c.bf16 %v1289_v53, %v1288_v50  ;;  %v3604_v50 = vld [vmem:[%s4563_s15 + $0x18] sm:$0xff] }
 0x345   : > { %2207 = vmatpush.bf16.msra.mxu3 %v3604_v50 }
 0x346   : > { %1498 = vmatmul.bf16.vlgmr.msrb.gmra.mxu2 %v1436_v58  ;;  %v3613_v58 = vld [vmem:[%s4563_s15 + $0x60] sm:$0xff] }
 0x347   : > { %2225 = vmatpush.bf16.msra.mxu0 %v3613_v58 }
 0x348   : > { %v1406_v59 = vpop.f32.mrf.mxu1 }
 0x349   : > { %v1416_v60 = vmul.f32 %v4639_v18, %v1406_v59  ;;  %v3620_v59 = vld [vmem:[%s4563_s15 + $0x98] sm:$0xff] }
 0x34a   : > { %2245 = vmatpush.bf16.msra.mxu1 %v3620_v59 }
 0x34b   : > { %v1418_v2 = vadd.f32 %v1416_v60, %v1412_v63  ;;  %v3629_v60 = vld [vmem:[%s4563_s15 + $0xe0] sm:$0xff] }
 0x34c   : > { %2263 = vmatpush.bf16.msra.mxu2 %v3629_v60 }
 0x350   : > { %v1409_v62 = vpop.f32.mrf.mxu1 }
 0x351   : > { %v1417_v1 = vmul.f32 %v4639_v18, %v1409_v62  ;;  %v3603_v62 = vld [vmem:[%s4563_s15 + $0x10] sm:$0xff] }
 0x352   : > { %2208 = vmatpush.bf16.msra.mxu3 %v3603_v62  ;;  %v3653_v62 = vld [vmem:[%s4563_s15 + $0x1a0] sm:$0xff] }
 0x353   : > { %v1419_v4 = vadd.f32 %v1417_v1, %v1413_v0  ;;  %v3612_v0 = vld [vmem:[%s4563_s15 + $0x58] sm:$0xff]  ;;  %v3619_v1 = vld [vmem:[%s4563_s15 + $0x90] sm:$0xff] }
 0x354   : > { %2226 = vmatpush.bf16.msra.mxu0 %v3612_v0  ;;  %2246 = vmatpush.bf16.msra.mxu1 %v3619_v1 }
 0x355   : > { %v1437_v5 = vpack.c.bf16 %v1419_v4, %v1418_v2  ;;  %v3628_v2 = vld [vmem:[%s4563_s15 + $0xd8] sm:$0xff] }
 0x356   : > { %2264 = vmatpush.bf16.msra.mxu2 %v3628_v2 }
 0x357   : > { %1503 = vmatmul.bf16.gmra.mxu2 %v1437_v5  ;;  %v3602_v5 = vld [vmem:[%s4563_s15 + $0x8] sm:$0xff] }
 0x358   : > { %2209 = vmatpush.bf16.msra.mxu3 %v3602_v5  ;;  %v4834_v5 = vld [vmem:[%s4563_s15 + $0x160] sm:$0xff] }
 0x3c9   : > { %v1499_v7 = vpop.f32.mrf.mxu2 }
 0x3ca   : > { %v1500_v8 = vadd.f32 %v3822_v6, %v1499_v7 }
 0x3cc   : > { %v1509_v9 = vadd.f32 %v1500_v8, %v4610_v51  ;;  %v1524_v51 = vmul.f32 128.0, %v3862_v17 }
 0x3ce   : > { %1515 = vadd.xlane.f32.xlu1 %v1509_v9  ;;  %v1525_v19 = vsub.f32 1.0, %v1524_v51 }
 0x3d0   : > { %v1526_v20 = vmul.f32 %v3862_v17, %v1525_v19  ;;  %v3640_v19 = vld [vmem:[%s4563_s15 + $0x138] sm:$0xff] }
 0x3d1   : > { %v1501_v10 = vpop.f32.mrf.mxu2 }
 0x3d2   : > { %v1502_v11 = vadd.f32 %v3822_v6, %v1501_v10  ;;  %v1527_v21 = vadd.f32 %v3862_v17, %v1526_v20  ;;  %v3618_v10 = vld [vmem:[%s4563_s15 + $0x88] sm:$0xff] }
 0x3d3   : > { %2247 = vmatpush.bf16.msra.mxu1 %v3618_v10 }
 0x3d4   : > { %v1510_v12 = vadd.f32 %v1502_v11, %v4612_v52  ;;  %v4728_v52 = vsel %vm1528_vm3, %v3862_v17, %v1527_v21  ;;  %v3627_v11 = vld [vmem:[%s4563_s15 + $0xd0] sm:$0xff]  ;;  %vm1655_vm3 = vcmask 1046528  }
 0x3d5   : > { %2265 = vmatpush.bf16.msra.mxu2 %v3627_v11  ;;  %v3635_v11 = vld [vmem:[%s4563_s15 + $0x110] sm:$0xff] }
 0x3d6   : > { %1517 = vadd.xlane.f32.xlu2 %v1510_v12 }
 0x3da   : > { %v1504_v13 = vpop.f32.mrf.mxu2 }
 0x3db   : > { %v1505_v3 = vadd.f32 %v3822_v6, %v1504_v13 }
 0x3dd   : > { %v1511_v18 = vadd.f32 %v1505_v3, %v4620_v55 }
 0x3df   : > { %1519 = vadd.xlane.f32.xlu0 %v1511_v18 }
 0x3e2   : > { %v1506_v61 = vpop.f32.mrf.mxu2 }
 0x3e3   : > { %v1507_v14 = vadd.f32 %v3822_v6, %v1506_v61  ;;  %v3617_v61 = vld [vmem:[%s4563_s15 + $0x80] sm:$0xff] }
 0x3e4   : > { %2248 = vmatpush.bf16.msra.mxu1 %v3617_v61 }
 0x3e5   : > { %v1512_v15 = vadd.f32 %v1507_v14, %v4622_v56 }
 0x3e7   : > { %1521 = vadd.xlane.f32.xlu1 %v1512_v15 }
 0x441   : > { %v1516_v22 = vpop.xlane.xlu1 %1515 }
 0x442   : > { %v1530_v23 = vmul.f32 %v4728_v52, %v1516_v22 }
 0x444   : > { %v4731_v55 = vsub.f32 %v1509_v9, %v1530_v23  ;;  %v3611_v9 = vld [vmem:[%s4563_s15 + $0x50] sm:$0xff]  ;;  %v3609_v23 = vld [vmem:[%s4563_s15 + $0x40] sm:$0xff] }
 0x445   : > { %2227 = vmatpush.bf16.msra.mxu0 %v3611_v9 }
 0x446   : > { %v1538_v24 = vmul.f32 %v4731_v55, %v4731_v55 }
 0x448   : > { %1542 = vadd.xlane.f32.xlu2 %v1538_v24  ;;  %v3625_v24 = vld [vmem:[%s4563_s15 + $0xc0] sm:$0xff] }
 0x449   : > { %v1518_v56 = vpop.xlane.xlu2 %1517 }
 0x44a   : > { %v1531_v25 = vmul.f32 %v4728_v52, %v1518_v56 }
 0x44c   : > { %v4736_v26 = vsub.f32 %v1510_v12, %v1531_v25  ;;  %v3601_v12 = vld [vmem:[%s4563_s15] sm:$0xff] }
 0x44d   : > { %2210 = vmatpush.bf16.msra.mxu3 %v3601_v12 }
 0x44e   : > { %v1539_v27 = vmul.f32 %v4736_v26, %v4736_v26 }
 0x450   : > { %1544 = vadd.xlane.f32.xlu0 %v1539_v27  ;;  %v3656_v27 = vld [vmem:[%s4563_s15 + $0x1b8] sm:$0xff] }
 0x451   : > { %2279 = vmatpush.bf16.msrb.mxu3 %v3640_v19  ;;  %2317 = vmatpush.bf16.msrb.mxu1 %v3656_v27 }
 0x452   : > { %v1520_v28 = vpop.xlane.xlu0 %1519 }
 0x453   : > { %v1532_v29 = vmul.f32 %v4728_v52, %v1520_v28  ;;  %v4789_v28 = vld [vmem:[%s5108_s18] ss:$0 sm:$0xff] }
 0x455   : > { %v4741_v54 = vsub.f32 %v1511_v18, %v1532_v29  ;;  %v3610_v18 = vld [vmem:[%s4563_s15 + $0x48] sm:$0xff] }
 0x456   : > { %2228 = vmatpush.bf16.msra.mxu0 %v3610_v18 }
 0x457   : > { %v1540_v57 = vmul.f32 %v4741_v54, %v4741_v54 }
 0x459   : > { %1546 = vadd.xlane.f32.xlu1 %v1540_v57 }
 0x45a   : > { %v1522_v30 = vpop.xlane.xlu1 %1521  ;;  %2229 = vmatpush.bf16.msra.mxu0 %v3609_v23  ;;  %v3650_v23 = vld [vmem:[%s4563_s15 + $0x188] sm:$0xff] }
 0x45b   : > { %v1533_v31 = vmul.f32 %v4728_v52, %v1522_v30 }
 0x45d   : > { %v4746_v32 = vsub.f32 %v1512_v15, %v1533_v31  ;;  %v3626_v15 = vld [vmem:[%s4563_s15 + $0xc8] sm:$0xff]  ;;  %v3639_v31 = vld [vmem:[%s4563_s15 + $0x130] sm:$0xff] }
 0x45e   : > { %2266 = vmatpush.bf16.msra.mxu2 %v3626_v15  ;;  %2280 = vmatpush.bf16.msrb.mxu3 %v3639_v31  ;;  %v4841_v15 = vld [vmem:[%s4563_s15 + $0x158] sm:$0xff] }
 0x45f   : > { %v1541_v33 = vmul.f32 %v4746_v32, %v4746_v32  ;;  %2298 = vmatpush.bf16.msrb.mxu0 %v4800_v37 }
 0x461   : > { %1548 = vadd.xlane.f32.xlu2 %v1541_v33  ;;  %v4795_v33 = vld [vmem:[%s5109_s0] ss:$0 sm:$0xff] }
 0x462   : > { %2267 = vmatpush.bf16.msra.mxu2 %v3625_v24  ;;  %2281 = vmatpush.bf16.msrb.mxu3 %v3638_v38 }
 0x463   : > { %2299 = vmatpush.bf16.msrb.mxu0 %v4808_v43 }
 0x4bb   : > { %v1543_v45 = vpop.xlane.xlu2 %1542 }
 0x4bc   : > { %v1550_v49 = vmul.f32 %v1543_v45, %v4728_v52 }
 0x4be   : > { %v1554_v53 = vadd.f32 1e-05, %v1550_v49  ;;  %v3637_v49 = vld [vmem:[%s4563_s15 + $0x120] sm:$0xff] }
 0x4bf   : > { %2282 = vmatpush.bf16.msrb.mxu3 %v3637_v49 }
 0x4c0   : > { %3863 = vrsqrt.f32 %v1554_v53  ;;  %vm1564_vm5 = vweird.f32 %v1554_v53 }
 0x4c3   : > { %v1545_v63 = vpop.xlane.xlu0 %1544 }
 0x4c4   : > { %v1551_v4 = vmul.f32 %v1545_v63, %v4728_v52  ;;  %v3636_v63 = vld [vmem:[%s4563_s15 + $0x118] sm:$0xff] }
 0x4c5   : > { %2283 = vmatpush.bf16.msrb.mxu3 %v3636_v63 }
 0x4c6   : > { %v3864_v6 = vpop.eup %3863  ;;  %v1555_v7 = vadd.f32 1e-05, %v1551_v4 }
 0x4c7   : > { %v1559_v8 = vmul.f32 %v3864_v6, %v1554_v53  ;;  %vm1565_vm4 = vweird.f32 %v3864_v6 }
 0x4c8   : > { %3865 = vrsqrt.f32 %v1555_v7  ;;  %vm1566_vm6 = vmor %vm1564_vm5, %vm1565_vm4  ;;  %vm1574_vm8 = vweird.f32 %v1555_v7  ;;  %vm1639_vm4 = vsmask.f32 7424  ;;  %vm1660_vm5 = vsmask.f32 6400 }
 0x4c9   : > { %v1560_v13 = vmul.f32 %v3864_v6, %v1559_v8  ;;  %2284 = vmatpush.bf16.msrb.mxu3 %v3635_v11 }
 0x4cb   : > { %v1561_v3 = vmul.f32 0.5, %v1560_v13 }
 0x4cc   : > { %v1547_v14 = vpop.xlane.xlu1 %1546 }
 0x4cd   : > { %v1562_v16 = vsub.f32 1.5, %v1561_v3  ;;  %v1552_v17 = vmul.f32 %v1547_v14, %v4728_v52 }
 0x4ce   : > { %v3866_v51 = vpop.eup %3865 }
 0x4cf   : > { %v1563_v20 = vmul.f32 %v3864_v6, %v1562_v16  ;;  %v1569_v21 = vmul.f32 %v3866_v51, %v1555_v7  ;;  %v1556_v22 = vadd.f32 1e-05, %v1552_v17  ;;  %vm1575_vm7 = vweird.f32 %v3866_v51  ;;  %v3651_v16 = vld [vmem:[%s4563_s15 + $0x190] sm:$0xff]  ;;  %v3634_v17 = vld [vmem:[%s4563_s15 + $0x108] sm:$0xff] }
 0x4d0   : > { %vm1576_vm9 = vmor %vm1574_vm8, %vm1575_vm7  ;;  %2285 = vmatpush.bf16.msrb.mxu3 %v3634_v17  ;;  %vm1685_vm7 = vcmask 1044480   ;;  %vm1676_vm8 = vsmask.f32 5376 }
 0x4d1   : > { %v1567_v56 = vsel %vm1566_vm6, %v3864_v6, %v1563_v20  ;;  %v1570_v25 = vmul.f32 %v3866_v51, %v1569_v21  ;;  %3867 = vrsqrt.f32 %v1556_v22  ;;  %vm1584_vm11 = vweird.f32 %v1556_v22  ;;  %v3652_v6 = vld [vmem:[%s4563_s15 + $0x198] sm:$0xff] }
 0x4d2   : > { %v1598_v29 = vmul.f32 %v1567_v56, %v4731_v55  ;;  %v3655_v55 = vld [vmem:[%s4563_s15 + $0x1b0] sm:$0xff]  ;;  %vm1671_vm6 = vcmask 1045504  }
 0x4d3   : > { %v1571_v57 = vmul.f32 0.5, %v1570_v25  ;;  %2318 = vmatpush.bf16.msrb.mxu1 %v3655_v55  ;;  %v3633_v25 = vld [vmem:[%s4563_s15 + $0x100] sm:$0xff] }
 0x4d4   : > { %v1549_v30 = vpop.xlane.xlu2 %1548  ;;  %v1605_v36 = vmul.f32 %v4789_v28, %v1598_v29  ;;  %2286 = vmatpush.bf16.msrb.mxu3 %v3633_v25 }
 0x4d5   : > { %v1572_v34 = vsub.f32 1.5, %v1571_v57  ;;  %v1553_v35 = vmul.f32 %v1549_v30, %v4728_v52 }
 0x4d6   : > { %v4813_v46 = vadd.f32 %v4795_v33, %v1605_v36 }
 0x4d7   : > { %v3868_v39 = vpop.eup %3867  ;;  %v1573_v40 = vmul.f32 %v3866_v51, %v1572_v34  ;;  %v4804_v41 = vadd.f32 1e-05, %v1553_v35  ;;  %2319 = vmatpush.bf16.msrb.mxu1 %v3654_v44 }
 0x4d8   : > { %v1579_v42 = vmul.f32 %v3868_v39, %v1556_v22  ;;  %v1616_v58 = vpack.c.bf16 %v4813_v46, %v4813_v46  ;;  %vm1585_vm10 = vweird.f32 %v3868_v39  ;;  %v4854_v22 = vld [vmem:[%s4563_s15 + $0x150] sm:$0xff] }
 0x4d9   : > { %v1577_v45 = vsel %vm1576_vm9, %v3866_v51, %v1573_v40  ;;  %3869 = vrsqrt.f32 %v4804_v41  ;;  %vm1586_vm12 = vmor %vm1584_vm11, %vm1585_vm10  ;;  %vm1594_vm0 = vweird.f32 %v4804_v41 }
 0x4da   : > { %v1599_v47 = vmul.f32 %v1577_v45, %v4736_v26  ;;  %v1580_v48 = vmul.f32 %v3868_v39, %v1579_v42  ;;  %v4825_v26 = vld [vmem:[%s4563_s15 + $0x168] sm:$0xff]  ;;  %v1622_v7 = vunpack.c.l.b16 %v1616_v58 }
 0x4db   : > { %2300 = vmatpush.bf16.msrb.mxu0 %v4825_v26  ;;  %2320 = vmatpush.bf16.msrb.mxu1 %v3653_v62 }
 0x4dc   : > { %v1606_v50 = vmul.f32 %v4789_v28, %v1599_v47  ;;  %v1581_v53 = vmul.f32 0.5, %v1580_v48 }
 0x4de   : > { %v4822_v59 = vadd.f32 %v4795_v33, %v1606_v50  ;;  %v1582_v60 = vsub.f32 1.5, %v1581_v53  ;;  %v3641_v50 = vld [vmem:[%s4563_s15 + $0x140] sm:$0xff] }
 0x4df   : > { %v3870_v0 = vpop.eup %3869  ;;  %2301 = vmatpush.bf16.msrb.mxu0 %v4834_v5  ;;  %2321 = vmatpush.bf16.msrb.mxu1 %v3652_v6 }
 0x4e0   : > { %v1617_v1 = vpack.c.bf16 %v4822_v59, %v4822_v59  ;;  %v1583_v2 = vmul.f32 %v3868_v39, %v1582_v60  ;;  %v1589_v4 = vmul.f32 %v3870_v0, %v4804_v41  ;;  %vm1595_vm15 = vweird.f32 %v3870_v0 }
 0x4e1   : > { %vm1596_vm2 = vmor %vm1594_vm0, %vm1595_vm15 }
 0x4e2   : > { %v1623_v8 = vunpack.c.l.b16 %v1617_v1  ;;  %v1587_v9 = vsel %vm1586_vm12, %v3868_v39, %v1583_v2  ;;  %v1590_v10 = vmul.f32 %v3870_v0, %v1589_v4  ;;  %v4887_v39 = vld [vmem:[%s4563_s15 + $0x148] sm:$0xff] }
 0x4e3   : > { %v1600_v12 = vmul.f32 %v1587_v9, %v4741_v54  ;;  %2302 = vmatpush.bf16.msrb.mxu0 %v4841_v15  ;;  %2322 = vmatpush.bf16.msrb.mxu1 %v3651_v16 }
 0x4e4   : > { %v1591_v13 = vmul.f32 0.5, %v1590_v10  ;;  %v1624_v3 = vpack.c.b16 %v1623_v8, %v1622_v7 }
 0x4e5   : > { %v1607_v54 = vmul.f32 %v4789_v28, %v1600_v12 }
 0x4e6   : > { %v1592_v18 = vsub.f32 1.5, %v1591_v13  ;;  %v1626_v61 = vshrl.u32 %v1624_v3, 16  ;;  %v1629_v14 = vshll.u32 %v1624_v3, 16 }
 0x4e7   : > { %v4860_v27 = vadd.f32 %v4795_v33, %v1607_v54  ;;  %2303 = vmatpush.bf16.msrb.mxu0 %v4854_v22  ;;  %2323 = vmatpush.bf16.msrb.mxu1 %v3650_v23 }
 0x4e8   : > { %v1593_v51 = vmul.f32 %v3870_v0, %v1592_v18  ;;  %v1628_v19 = vrot.slane %v1626_v61, 6  ;;  %v1631_v20 = vrot.slane %v1629_v14, 7 }
 0x4e9   : > { %v1618_v40 = vpack.c.bf16 %v4860_v27, %v4860_v27 }
 0x4ea   : > { %v1597_v24 = vsel %vm1596_vm2, %v3870_v0, %v1593_v51  ;;  %v1632_v56 = vor.u32 %v1631_v20, %v1628_v19 }
 0x4eb   : > { %v1601_v29 = vmul.f32 %v1597_v24, %v4746_v32  ;;  %2304 = vmatpush.bf16.msrb.mxu0 %v4887_v39  ;;  %v1692_v60 = vunpack.c.l.b16 %v1618_v40 }
 0x4ec   : > { %v4865_v57 = vsel %vm4848_vm1, 0, %v1632_v56  ;;  %v4869_v30 = vsel %vm4848_vm1, %v1632_v56, 0 }
 0x4ed   : > { %v1608_v31 = vmul.f32 %v4789_v28, %v1601_v29  ;;  %2211 = vmatmul.bf16.vlgmr.msra.gmra.mxu3 %v4865_v57  ;;  %v1656_v34 = vrot.slane %v4865_v57, 1  ;;  %v1657_v32 = vrot.slane %v4869_v30, 1  ;;  %v4877_v35 = vshrl.u32 %v4865_v57, 16  ;;  %v3649_v28 = vld [vmem:[%s4563_s15 + $0x180] sm:$0xff]  ;;  %s5114_s15 = scalar_lea.vmem [#allocation14], %s4506_s13 }
 0x4ee   : > { %v4880_v36 = vshll.u32 %v4865_v57, 16  ;;  %v4883_v55 = vshll.u32 %v4869_v30, 16  ;;  %v1664_v38 = vshrl.u32 %v4869_v30, 16  ;;  %3689 = vmatpush.bf16.msra.mxu3 %v4800_v37  ;;  %2324 = vmatpush.bf16.msrb.mxu1 %v3649_v28  ;;  %v1673_v56 = vrot.slane %v4869_v30, 2 }
 0x4ef   : > { %v4893_v41 = vadd.f32 %v4795_v33, %v1608_v31  ;;  %v1658_v42 = vsel %vm1655_vm3, %v1656_v34, %v1657_v32  ;;  %v1661_v44 = vrot.slane %v4877_v35, 1  ;;  %2305 = vmatpush.bf16.msrb.mxu0 %v3641_v50  ;;  %v1686_v25 = vrot.slane %v4865_v57, 3 }
 0x4f0   : > { %2249 = vmatmul.bf16.vlgmr.msra.gmra.mxu1 %v1658_v42  ;;  %v1645_v45 = vrot.slane %v4880_v36, 1  ;;  %v1662_v47 = vrot.slane %v4880_v36, 2  ;;  %v1666_v48 = vrot.slane %v1664_v38, 1  ;;  %v1667_v49 = vrot.slane %v4883_v55, 2 }
 0x4f1   : > { %v1619_v33 = vpack.c.bf16 %v4893_v41, %v4893_v41  ;;  %v1650_v53 = vrot.slane %v4883_v55, 1  ;;  %v1687_v29 = vrot.slane %v4869_v30, 3  ;;  %v1678_v31 = vrot.slane %v4880_v36, 3 }
 0x4f2   : > { %v1646_v37 = vor.u32 %v1645_v45, %v4877_v35  ;;  %v1663_v58 = vor.u32 %v1662_v47, %v1661_v44  ;;  %v1668_v63 = vor.u32 %v1667_v49, %v1666_v48  ;;  %3690 = vmatpush.bf16.msra.mxu3 %v4808_v43  ;;  %v1680_v34 = vrot.slane %v1664_v38, 2 }
 0x4f3   : > { %v1693_v62 = vunpack.c.l.b16 %v1619_v33  ;;  %v1681_v32 = vrot.slane %v4883_v55, 3  ;;  %v1688_v28 = vsel %vm1685_vm7, %v1686_v25, %v1687_v29 }
 0x4f4   : > { %v1651_v0 = vsel %vm1639_vm4, %v1646_v37, %v1650_v53  ;;  %v1669_v1 = vsel %vm1660_vm5, %v1663_v58, %v1668_v63  ;;  %v3664_v53 = vld [vmem:[%s4531_s4 + $0x38] sm:$0xff]  ;;  %v3663_v58 = vld [vmem:[%s4531_s4 + $0x30] sm:$0xff] }
 0x4f5   : > { %2230 = vmatmul.bf16.vlgmr.msra.gmra.mxu0 %v1651_v0  ;;  %v1694_v2 = vpack.c.b16 %v1693_v62, %v1692_v60  ;;  %2268 = vmatmul.bf16.vlgmr.msra.gmra.mxu2 %v1669_v1  ;;  %v1682_v42 = vor.u32 %v1681_v32, %v1680_v34  ;;  %v3662_v60 = vld [vmem:[%s4531_s4 + $0x28] sm:$0xff]  ;;  %v3661_v1 = vld [vmem:[%s4531_s4 + $0x20] sm:$0xff] }
 0x4f6   : > { %3691 = vmatpush.bf16.msra.mxu3 %v4825_v26  ;;  %2410 = vmatpush.bf16.msrb.mxu2 %v3664_v53 }
 0x4f7   : > { %v1696_v4 = vshrl.u32 %v1694_v2, 16  ;;  %v1699_v6 = vshll.u32 %v1694_v2, 16 }
 0x4f9   : > { %v1698_v7 = vrot.slane %v1696_v4, 6  ;;  %v1701_v8 = vrot.slane %v1699_v6, 7  ;;  %v3660_v4 = vld [vmem:[%s4531_s4 + $0x18] sm:$0xff] }
 0x4fa   : > { %3692 = vmatpush.bf16.msra.mxu3 %v4834_v5  ;;  %2411 = vmatpush.bf16.msrb.mxu2 %v3663_v58 }
 0x4fb   : > { %v1702_v9 = vor.u32 %v1701_v8, %v1698_v7  ;;  %v3659_v8 = vld [vmem:[%s4531_s4 + $0x10] sm:$0xff] }
 0x4fd   : > { %v1704_v43 = vsel %vm4848_vm1, 0, %v1702_v9  ;;  %v1705_v10 = vsel %vm4848_vm1, %v1702_v9, 0 }
 0x4fe   : > { %2216 = vmatmul.bf16.gmra.mxu3 %v1704_v43  ;;  %v1721_v11 = vrot.slane %v1704_v43, 1  ;;  %v1722_v12 = vrot.slane %v1705_v10, 1  ;;  %v1707_v13 = vshrl.u32 %v1704_v43, 16  ;;  %v1709_v3 = vshll.u32 %v1704_v43, 16  ;;  %2412 = vmatpush.bf16.msrb.mxu2 %v3662_v60 }
 0x4ff   : > { %v1714_v18 = vshll.u32 %v1705_v10, 16  ;;  %v1728_v61 = vshrl.u32 %v1705_v10, 16  ;;  %3693 = vmatpush.bf16.msra.mxu3 %v4841_v15  ;;  %v1672_v15 = vrot.slane %v4865_v57, 2  ;;  %v1736_v36 = vrot.slane %v1705_v10, 2 }
 0x500   : > { %v1723_v26 = vsel %vm1655_vm3, %v1721_v11, %v1722_v12  ;;  %v1711_v14 = vrot.slane %v1709_v3, 1  ;;  %v1725_v16 = vrot.slane %v1707_v13, 1  ;;  %v1726_v5 = vrot.slane %v1709_v3, 2  ;;  %v3825_v11 = vld [vmem:[%s5112_s14] ss:$0 sm:$0xff] }
 0x501   : > { %2254 = vmatmul.bf16.gmra.mxu1 %v1723_v26  ;;  %v1730_v17 = vrot.slane %v1728_v61, 1  ;;  %v1731_v54 = vrot.slane %v1714_v18, 2  ;;  %v1716_v19 = vrot.slane %v1714_v18, 1  ;;  %v1747_v44 = vrot.slane %v1704_v43, 3 }
 0x502   : > { %v1712_v51 = vor.u32 %v1711_v14, %v1707_v13  ;;  %v1727_v20 = vor.u32 %v1726_v5, %v1725_v16  ;;  %v1748_v30 = vrot.slane %v1705_v10, 3  ;;  %v1739_v45 = vrot.slane %v1707_v13, 2  ;;  %2413 = vmatpush.bf16.msrb.mxu2 %v3661_v1  ;;  %v3658_v10 = vld [vmem:[%s4531_s4 + $0x8] sm:$0xff]  ;;  %v3657_v13 = vld [vmem:[%s4531_s4] sm:$0xff]  ;;  %s5113_s4 = scalar_lea.vmem [#allocation13], %s4506_s13 }
 0x503   : > { %v1732_v21 = vor.u32 %v1731_v54, %v1730_v17  ;;  %3694 = vmatpush.bf16.msra.mxu3 %v4854_v22  ;;  %v1677_v22 = vrot.slane %v4877_v35, 2  ;;  %v1735_v35 = vrot.slane %v1704_v43, 2  ;;  %v1740_v47 = vrot.slane %v1709_v3, 3 }
 0x504   : > { %v1717_v23 = vsel %vm1639_vm4, %v1712_v51, %v1716_v19  ;;  %v1749_v38 = vsel %vm1685_vm7, %v1747_v44, %v1748_v30  ;;  %v1742_v48 = vrot.slane %v1728_v61, 2  ;;  %v1743_v33 = vrot.slane %v1714_v18, 3 }
 0x505   : > { %2235 = vmatmul.bf16.gmra.mxu0 %v1717_v23  ;;  %v1733_v24 = vsel %vm1660_vm5, %v1727_v20, %v1732_v21  ;;  %v1679_v40 = vor.u32 %v1678_v31, %v1677_v22  ;;  %v1737_v55 = vsel %vm1671_vm6, %v1735_v35, %v1736_v36  ;;  %v1741_v49 = vor.u32 %v1740_v47, %v1739_v45 }
 0x506   : > { %2273 = vmatmul.bf16.gmra.mxu2 %v1733_v24 }
 0x507   : > { %3695 = vmatpush.bf16.msra.mxu3 %v4887_v39  ;;  %v1674_v39 = vsel %vm1671_vm6, %v1672_v15, %v1673_v56  ;;  %v1683_v57 = vsel %vm1676_vm8, %v1679_v40, %v1682_v42  ;;  %2414 = vmatpush.bf16.msrb.mxu2 %v3660_v4 }
 0x50b   : > { %3696 = vmatpush.bf16.msra.mxu3 %v3641_v50  ;;  %v1744_v50 = vor.u32 %v1743_v33, %v1742_v48  ;;  %2415 = vmatpush.bf16.msrb.mxu2 %v3659_v8 }
 0x50d   : > { %v1745_v37 = vsel %vm1676_vm8, %v1741_v49, %v1744_v50 }
 0x50e   : > { %2287 = vmatmul.bf16.vlgmr.msrb.gmra.mxu3 %v1674_v39 }
 0x50f   : > { %2416 = vmatpush.bf16.msrb.mxu2 %v3658_v10 }
 0x511   : > { %2325 = vmatmul.bf16.vlgmr.msrb.gmra.mxu1 %v1688_v28 }
 0x513   : > { %2417 = vmatpush.bf16.msrb.mxu2 %v3657_v13 }
 0x515   : > { %2306 = vmatmul.bf16.vlgmr.msrb.gmra.mxu0 %v1683_v57 }
 0x51e   : > { %2292 = vmatmul.bf16.gmra.mxu3 %v1737_v55 }
 0x521   : > { %2330 = vmatmul.bf16.gmra.mxu1 %v1749_v38 }
 0x52e   : > { %2311 = vmatmul.bf16.vlgmr.msra.gmra.mxu3 %v1745_v37 }
 0x56d   : > { %v2250_v62 = vpop.f32.mrf.mxu1 }
 0x570   : > { %v2212_v63 = vpop.f32.mrf.mxu3 }
 0x571   : > { %v2213_v3 = vadd.f32 %v3825_v11, %v2212_v63 }
 0x572   : > { %v2231_v0 = vpop.f32.mrf.mxu0 }
 0x573   : > { %v2232_v26 = vadd.f32 %v2231_v0, %v2213_v3 }
 0x575   : > { %v2252_v2 = vpop.f32.mrf.mxu1  ;;  %v2251_v17 = vadd.f32 %v2250_v62, %v2232_v26 }
 0x578   : > { %v2214_v6 = vpop.f32.mrf.mxu3  ;;  %v2269_v16 = vpop.f32.mrf.mxu2 }
 0x579   : > { %v2215_v5 = vadd.f32 %v3825_v11, %v2214_v6  ;;  %v2270_v19 = vadd.f32 %v2269_v16, %v2251_v17 }
 0x57a   : > { %v2233_v7 = vpop.f32.mrf.mxu0 }
 0x57b   : > { %v2234_v54 = vadd.f32 %v2233_v7, %v2215_v5 }
 0x57d   : > { %v2253_v23 = vadd.f32 %v2252_v2, %v2234_v54 }
 0x57e   : > { %v2255_v9 = vpop.f32.mrf.mxu1 }
 0x580   : > { %v2271_v15 = vpop.f32.mrf.mxu2 }
 0x581   : > { %v2217_v43 = vpop.f32.mrf.mxu3  ;;  %v2272_v56 = vadd.f32 %v2271_v15, %v2253_v23 }
 0x582   : > { %v2236_v12 = vpop.f32.mrf.mxu0  ;;  %v2218_v36 = vadd.f32 %v3825_v11, %v2217_v43 }
 0x584   : > { %v2237_v55 = vadd.f32 %v2236_v12, %v2218_v36 }
 0x586   : > { %v2257_v18 = vpop.f32.mrf.mxu1  ;;  %v2256_v45 = vadd.f32 %v2255_v9, %v2237_v55  ;;  %v3826_v9 = vld [vmem:[%s5113_s4] ss:$0 sm:$0xff] }
 0x589   : > { %v2219_v61 = vpop.f32.mrf.mxu3  ;;  %v2274_v44 = vpop.f32.mrf.mxu2 }
 0x58a   : > { %v2238_v14 = vpop.f32.mrf.mxu0  ;;  %v2220_v38 = vadd.f32 %v3825_v11, %v2219_v61  ;;  %v2275_v49 = vadd.f32 %v2274_v44, %v2256_v45 }
 0x58c   : > { %v2239_v47 = vadd.f32 %v2238_v14, %v2220_v38  ;;  %v3827_v38 = vld [vmem:[%s5114_s15] ss:$0 sm:$0xff] }
 0x58e   : > { %v2326_v21 = vpop.f32.mrf.mxu1  ;;  %v2258_v50 = vadd.f32 %v2257_v18, %v2239_v47 }
 0x591   : > { %v2288_v51 = vpop.f32.mrf.mxu3  ;;  %v2276_v37 = vpop.f32.mrf.mxu2 }
 0x592   : > { %v2307_v20 = vpop.f32.mrf.mxu0  ;;  %v2289_v24 = vadd.f32 %v2288_v51, %v2270_v19  ;;  %v2277_v58 = vadd.f32 %v2276_v37, %v2258_v50 }
 0x594   : > { %v2308_v25 = vadd.f32 %v2307_v20, %v2289_v24 }
 0x596   : > { %v2327_v34 = vadd.f32 %v2326_v21, %v2308_v25  ;;  %v2328_v39 = vpop.f32.mrf.mxu1 }
 0x598   : > { %v2336_v40 = vmax.f32 %v2327_v34, 0.0 }
 0x599   : > { %v2290_v29 = vpop.f32.mrf.mxu3 }
 0x59a   : > { %v2291_v22 = vadd.f32 %v2290_v29, %v2272_v56  ;;  %v2309_v31 = vpop.f32.mrf.mxu0 }
 0x59c   : > { %v2310_v32 = vadd.f32 %v2309_v31, %v2291_v22 }
 0x59e   : > { %v2329_v28 = vadd.f32 %v2328_v39, %v2310_v32  ;;  %v2331_v48 = vpop.f32.mrf.mxu1 }
 0x5a0   : > { %v2337_v42 = vmax.f32 %v2329_v28, 0.0 }
 0x5a1   : > { %v2293_v57 = vpop.f32.mrf.mxu3 }
 0x5a2   : > { %v2356_v35 = vpack.c.bf16 %v2337_v42, %v2336_v40  ;;  %v2294_v53 = vadd.f32 %v2293_v57, %v2275_v49 }
 0x5a4   : > { %2418 = vmatmul.bf16.vlgmr.msrb.gmra.mxu2 %v2356_v35 }
 0x5a6   : > { %v2333_v2 = vpop.f32.mrf.mxu1 }
 0x5a9   : > { %v2295_v30 = vpop.f32.mrf.mxu3 }
 0x5aa   : > { %v2296_v62 = vadd.f32 %v2295_v30, %v2277_v58 }
 0x5b1   : > { %v2312_v33 = vpop.f32.mrf.mxu3 }
 0x5b2   : > { %v2313_v60 = vadd.f32 %v2312_v33, %v2294_v53 }
 0x5b4   : > { %v2332_v0 = vadd.f32 %v2331_v48, %v2313_v60  ;;  %v3828_v48 = vld [vmem:[%s5115_s9] ss:$0 sm:$0xff] }
 0x5b6   : > { %v2338_v6 = vmax.f32 %v2332_v0, 0.0 }
 0x5b9   : > { %v2314_v63 = vpop.f32.mrf.mxu3 }
 0x5ba   : > { %v2315_v1 = vadd.f32 %v2314_v63, %v2296_v62 }
 0x5bc   : > { %v2334_v4 = vadd.f32 %v2333_v2, %v2315_v1 }
 0x5be   : > { %v2339_v7 = vmax.f32 %v2334_v4, 0.0 }
 0x5c0   : > { %v2357_v8 = vpack.c.bf16 %v2339_v7, %v2338_v6 }
 0x5c2   : > { %2423 = vmatmul.bf16.gmra.mxu2 %v2357_v8 }
 0x627   : > { %v2419_v43 = vpop.f32.mrf.mxu2 }
 0x628   : > { %v2420_v10 = vadd.f32 %v3826_v9, %v2419_v43 }
 0x62a   : > { %v2429_v11 = vadd.f32 %v2420_v10, %v4813_v46 }
 0x62c   : > { %2435 = vadd.xlane.f32.xlu0 %v2429_v11 }
 0x62f   : > { %v2421_v12 = vpop.f32.mrf.mxu2 }
 0x630   : > { %v2422_v13 = vadd.f32 %v3826_v9, %v2421_v12 }
 0x632   : > { %v2430_v3 = vadd.f32 %v2422_v13, %v4822_v59 }
 0x634   : > { %2437 = vadd.xlane.f32.xlu1 %v2430_v3 }
 0x645   : > { %v2424_v18 = vpop.f32.mrf.mxu2 }
 0x646   : > { %v2425_v61 = vadd.f32 %v3826_v9, %v2424_v18 }
 0x648   : > { %v2431_v26 = vadd.f32 %v2425_v61, %v4860_v27 }
 0x64a   : > { %2439 = vadd.xlane.f32.xlu2 %v2431_v26 }
 0x64d   : > { %v2426_v14 = vpop.f32.mrf.mxu2 }
 0x64e   : > { %v2427_v16 = vadd.f32 %v3826_v9, %v2426_v14 }
 0x650   : > { %v2432_v5 = vadd.f32 %v2427_v16, %v4893_v41 }
 0x652   : > { %2441 = vadd.xlane.f32.xlu0 %v2432_v5 }
 0x69f   : > { %v2436_v17 = vpop.xlane.xlu0 %2435 }
 0x6a0   : > { %v2443_v54 = vmul.f32 %v2436_v17, %v4728_v52 }
 0x6a2   : > { %v2447_v46 = vsub.f32 %v2429_v11, %v2443_v54 }
 0x6a4   : > { %v2451_v51 = vmul.f32 %v2447_v46, %v2447_v46 }
 0x6a6   : > { %2455 = vadd.xlane.f32.xlu1 %v2451_v51 }
 0x6a7   : > { %v2438_v19 = vpop.xlane.xlu1 %2437 }
 0x6a8   : > { %v2444_v59 = vmul.f32 %v2438_v19, %v4728_v52 }
 0x6aa   : > { %v2448_v20 = vsub.f32 %v2430_v3, %v2444_v59 }
 0x6ac   : > { %v2452_v21 = vmul.f32 %v2448_v20, %v2448_v20 }
 0x6ae   : > { %2457 = vadd.xlane.f32.xlu2 %v2452_v21 }
 0x6bd   : > { %v2440_v23 = vpop.xlane.xlu2 %2439 }
 0x6be   : > { %v2445_v27 = vmul.f32 %v2440_v23, %v4728_v52 }
 0x6c0   : > { %v4956_v24 = vsub.f32 %v2431_v26, %v2445_v27 }
 0x6c2   : > { %v2453_v41 = vmul.f32 %v4956_v24, %v4956_v24 }
 0x6c4   : > { %2459 = vadd.xlane.f32.xlu0 %v2453_v41 }
 0x6c5   : > { %v2442_v15 = vpop.xlane.xlu0 %2441 }
 0x6c6   : > { %v2446_v56 = vmul.f32 %v2442_v15, %v4728_v52 }
 0x6c8   : > { %v4961_v25 = vsub.f32 %v2432_v5, %v2446_v56 }
 0x6ca   : > { %v2454_v29 = vmul.f32 %v4961_v25, %v4961_v25 }
 0x6cc   : > { %2461 = vadd.xlane.f32.xlu1 %v2454_v29 }
 0x719   : > { %v2456_v22 = vpop.xlane.xlu1 %2455 }
 0x71a   : > { %v2463_v31 = vmul.f32 %v2456_v22, %v4728_v52 }
 0x71c   : > { %v2467_v34 = vadd.f32 1e-05, %v2463_v31 }
 0x71e   : > { %3871 = vrsqrt.f32 %v2467_v34  ;;  %vm2477_vm10 = vweird.f32 %v2467_v34 }
 0x721   : > { %v2458_v32 = vpop.xlane.xlu2 %2457 }
 0x722   : > { %v2464_v39 = vmul.f32 %v2458_v32, %v4728_v52 }
 0x724   : > { %v3872_v28 = vpop.eup %3871  ;;  %v2468_v40 = vadd.f32 1e-05, %v2464_v39 }
 0x725   : > { %v2472_v42 = vmul.f32 %v3872_v28, %v2467_v34  ;;  %vm2478_vm9 = vweird.f32 %v3872_v28 }
 0x726   : > { %3873 = vrsqrt.f32 %v2468_v40  ;;  %vm2479_vm11 = vmor %vm2477_vm10, %vm2478_vm9  ;;  %vm2487_vm13 = vweird.f32 %v2468_v40 }
 0x727   : > { %v2473_v57 = vmul.f32 %v3872_v28, %v2472_v42 }
 0x729   : > { %v2474_v35 = vmul.f32 0.5, %v2473_v57 }
 0x72b   : > { %v2475_v36 = vsub.f32 1.5, %v2474_v35 }
 0x72c   : > { %v3874_v44 = vpop.eup %3873 }
 0x72d   : > { %v2476_v30 = vmul.f32 %v3872_v28, %v2475_v36  ;;  %v2482_v55 = vmul.f32 %v3874_v44, %v2468_v40  ;;  %vm2488_vm12 = vweird.f32 %v3874_v44 }
 0x72e   : > { %vm2489_vm14 = vmor %vm2487_vm13, %vm2488_vm12 }
 0x72f   : > { %v2480_v45 = vsel %vm2479_vm11, %v3872_v28, %v2476_v30  ;;  %v2483_v47 = vmul.f32 %v3874_v44, %v2482_v55 }
 0x730   : > { %v2511_v33 = vmul.f32 %v2480_v45, %v2447_v46 }
 0x731   : > { %v2484_v49 = vmul.f32 0.5, %v2483_v47 }
 0x732   : > { %v2518_v50 = vmul.f32 %v3827_v38, %v2511_v33 }
 0x733   : > { %v2485_v37 = vsub.f32 1.5, %v2484_v49 }
 0x734   : > { %v4971_v53 = vadd.f32 %v3828_v48, %v2518_v50 }
 0x735   : > { %v2486_v58 = vmul.f32 %v3874_v44, %v2485_v37 }
 0x736   : > { %2529 = vst [vmem:[#allocation2 + $0x10] sm:$0xff] %v4971_v53 }
 0x737   : > { %v2490_v60 = vsel %vm2489_vm14, %v3874_v44, %v2486_v58  ;;  %v2460_v62 = vpop.xlane.xlu0 %2459 }
 0x738   : > { %v2512_v63 = vmul.f32 %v2490_v60, %v2448_v20  ;;  %v2465_v0 = vmul.f32 %v2460_v62, %v4728_v52 }
 0x73a   : > { %v2519_v1 = vmul.f32 %v3827_v38, %v2512_v63  ;;  %v2469_v2 = vadd.f32 1e-05, %v2465_v0 }
 0x73c   : > { %v4975_v4 = vadd.f32 %v3828_v48, %v2519_v1  ;;  %3875 = vrsqrt.f32 %v2469_v2  ;;  %vm2497_vm0 = vweird.f32 %v2469_v2 }
 0x73e   : > { %2530 = vst [vmem:[#allocation2] sm:$0xff] %v4975_v4 }
 0x73f   : > { %v2462_v6 = vpop.xlane.xlu1 %2461 }
 0x740   : > { %v2466_v7 = vmul.f32 %v2462_v6, %v4728_v52 }
 0x742   : > { %v3876_v8 = vpop.eup %3875  ;;  %v2470_v9 = vadd.f32 1e-05, %v2466_v7 }
 0x743   : > { %v2492_v43 = vmul.f32 %v3876_v8, %v2469_v2  ;;  %vm2498_vm15 = vweird.f32 %v3876_v8 }
 0x744   : > { %3877 = vrsqrt.f32 %v2470_v9  ;;  %vm2499_vm1 = vmor %vm2497_vm0, %vm2498_vm15  ;;  %vm2507_vm3 = vweird.f32 %v2470_v9 }
 0x745   : > { %v2493_v10 = vmul.f32 %v3876_v8, %v2492_v43 }
 0x747   : > { %v2494_v11 = vmul.f32 0.5, %v2493_v10 }
 0x749   : > { %v2495_v12 = vsub.f32 1.5, %v2494_v11 }
 0x74a   : > { %v3878_v13 = vpop.eup %3877 }
 0x74b   : > { %v2496_v3 = vmul.f32 %v3876_v8, %v2495_v12  ;;  %v2502_v18 = vmul.f32 %v3878_v13, %v2470_v9  ;;  %vm2508_vm2 = vweird.f32 %v3878_v13 }
 0x74c   : > { %vm2509_vm4 = vmor %vm2507_vm3, %vm2508_vm2 }
 0x74d   : > { %v2500_v61 = vsel %vm2499_vm1, %v3876_v8, %v2496_v3  ;;  %v2503_v26 = vmul.f32 %v3878_v13, %v2502_v18 }
 0x74e   : > { %v2513_v14 = vmul.f32 %v2500_v61, %v4956_v24 }
 0x74f   : > { %v2504_v16 = vmul.f32 0.5, %v2503_v26 }
 0x750   : > { %v2520_v5 = vmul.f32 %v3827_v38, %v2513_v14 }
 0x751   : > { %v2505_v52 = vsub.f32 1.5, %v2504_v16 }
 0x752   : > { %v4980_v17 = vadd.f32 %v3828_v48, %v2520_v5 }
 0x753   : > { %v2506_v54 = vmul.f32 %v3878_v13, %v2505_v52 }
 0x754   : > { %2531 = vst [vmem:[#allocation2 + $0x18] sm:$0xff] %v4980_v17 }
 0x755   : > { %v2510_v46 = vsel %vm2509_vm4, %v3878_v13, %v2506_v54 }
 0x756   : > { %v2514_v51 = vmul.f32 %v2510_v46, %v4961_v25 }
 0x758   : > { %v2521_v19 = vmul.f32 %v3827_v38, %v2514_v51  ;;  %2536 = sbr.rel (%p3466_p3) target bundleno = 2079 (0x81f), region = 128 }
 0x75a   : > { %v4984_v59 = vadd.f32 %v3828_v48, %v2521_v19 }
 0x75c   : > { %2532 = vst [vmem:[#allocation2 + $0x8] sm:$0xff] %v4984_v59 }
 0x75d   : > { %v3686_v20 = vld [vmem:[#allocation17 + $0xac] sm:$0xf]  ;;  %v3555_v21 = vld [vmem:[#allocation17 + $0xb4] sm:$0xf0]  ;;  %v3561_v23 = vld [vmem:[#allocation17 + $0xb0] sm:$0xf] }
 0x75e   : > { %v3558_v27 = vor.u32 %v3686_v20, %v3555_v21  ;;  %v3688_v24 = vld [vmem:[#allocation17 + $0xb8] sm:$0xf0]  ;;  %v3683_v41 = vld [vmem:[#allocation17 + $0x94] sm:$0xf]  ;;  %v3543_v15 = vld [vmem:[#allocation17 + $0x9c] sm:$0xf0] }
 0x75f   : > { %v3562_v56 = vor.u32 %v3688_v24, %v3561_v23  ;;  %v3549_v29 = vld [vmem:[#allocation17 + $0x98] sm:$0xf]  ;;  %v3685_v22 = vld [vmem:[#allocation17 + $0xa0] sm:$0xf0]  ;;  %v3553_v31 = vld [vmem:[#allocation17 + $0xa8] sm:$0xf]  ;;  %v3546_v25 = vor.u32 %v3683_v41, %v3543_v15 }
 0x760   : > { %2726 = vmatpush.bf16.msra.mxu1 %v3558_v27  ;;  %v3687_v34 = vld [vmem:[#allocation17 + $0xb0] sm:$0xf0]  ;;  %v3550_v32 = vor.u32 %v3685_v22, %v3549_v29  ;;  %v3680_v28 = vld [vmem:[#allocation17 + $0x7c] sm:$0xf]  ;;  %v3531_v40 = vld [vmem:[#allocation17 + $0x84] sm:$0xf0] }
 0x761   : > { %2745 = vmatpush.bf16.msra.mxu2 %v3562_v56  ;;  %v3554_v39 = vor.u32 %v3687_v34, %v3553_v31  ;;  %v3541_v42 = vld [vmem:[#allocation17 + $0x90] sm:$0xf]  ;;  %v3537_v57 = vld [vmem:[#allocation17 + $0x80] sm:$0xf]  ;;  %v3682_v35 = vld [vmem:[#allocation17 + $0x88] sm:$0xf0]  ;;  %v3534_v30 = vor.u32 %v3680_v28, %v3531_v40 }
 0x762   : > { %v3684_v36 = vld [vmem:[#allocation17 + $0x98] sm:$0xf0]  ;;  %v3529_v55 = vld [vmem:[#allocation17 + $0x78] sm:$0xf]  ;;  %v3681_v38 = vld [vmem:[#allocation17 + $0x80] sm:$0xf0]  ;;  %v3538_v45 = vor.u32 %v3682_v35, %v3537_v57 }
 0x763   : > { %3697 = vmatpush.bf16.msra.mxu3 %v3554_v39  ;;  %v3542_v44 = vor.u32 %v3684_v36, %v3541_v42  ;;  %2707 = vmatpush.bf16.msra.mxu0 %v3554_v39  ;;  %v3677_v47 = vld [vmem:[#allocation17 + $0x64] sm:$0xf]  ;;  %v3519_v48 = vld [vmem:[#allocation17 + $0x6c] sm:$0xf0]  ;;  %v3525_v33 = vld [vmem:[#allocation17 + $0x68] sm:$0xf]  ;;  %v3530_v50 = vor.u32 %v3681_v38, %v3529_v55 }
 0x764   : > { %2727 = vmatpush.bf16.msra.mxu1 %v3546_v25  ;;  %v3679_v49 = vld [vmem:[#allocation17 + $0x70] sm:$0xf0]  ;;  %v3522_v37 = vor.u32 %v3677_v47, %v3519_v48  ;;  %v3517_v58 = vld [vmem:[#allocation17 + $0x60] sm:$0xf]  ;;  %v3678_v60 = vld [vmem:[#allocation17 + $0x68] sm:$0xf0]  ;;  %v2569_v25 = vpack.c.bf16 %v4975_v4, %v4971_v53 }
 0x765   : > { %2746 = vmatpush.bf16.msra.mxu2 %v3550_v32  ;;  %v3526_v62 = vor.u32 %v3679_v49, %v3525_v33  ;;  %v3674_v63 = vld [vmem:[#allocation17 + $0x4c] sm:$0xf]  ;;  %v3507_v0 = vld [vmem:[#allocation17 + $0x54] sm:$0xf0]  ;;  %v3513_v1 = vld [vmem:[#allocation17 + $0x50] sm:$0xf]  ;;  %v3518_v6 = vor.u32 %v3678_v60, %v3517_v58  ;;  %v2570_v32 = vpack.c.bf16 %v4984_v59, %v4980_v17 }
 0x766   : > { %v3676_v2 = vld [vmem:[#allocation17 + $0x58] sm:$0xf0]  ;;  %v3510_v7 = vor.u32 %v3674_v63, %v3507_v0  ;;  %v3505_v8 = vld [vmem:[#allocation17 + $0x48] sm:$0xf]  ;;  %v3675_v9 = vld [vmem:[#allocation17 + $0x50] sm:$0xf0] }
 0x767   : > { %3698 = vmatpush.bf16.msra.mxu3 %v3542_v44  ;;  %2708 = vmatpush.bf16.msra.mxu0 %v3542_v44  ;;  %v3514_v43 = vor.u32 %v3676_v2, %v3513_v1  ;;  %v3671_v10 = vld [vmem:[#allocation17 + $0x34] sm:$0xf]  ;;  %v3495_v11 = vld [vmem:[#allocation17 + $0x3c] sm:$0xf0]  ;;  %v3501_v12 = vld [vmem:[#allocation17 + $0x38] sm:$0xf]  ;;  %v3506_v3 = vor.u32 %v3675_v9, %v3505_v8 }
 0x768   : > { %2728 = vmatpush.bf16.msra.mxu1 %v3534_v30  ;;  %v3673_v13 = vld [vmem:[#allocation17 + $0x40] sm:$0xf0]  ;;  %v3498_v18 = vor.u32 %v3671_v10, %v3495_v11  ;;  %v3493_v61 = vld [vmem:[#allocation17 + $0x30] sm:$0xf]  ;;  %v3672_v26 = vld [vmem:[#allocation17 + $0x38] sm:$0xf0] }
 0x769   : > { %2747 = vmatpush.bf16.msra.mxu2 %v3538_v45  ;;  %v3502_v14 = vor.u32 %v3673_v13, %v3501_v12  ;;  %v3668_v16 = vld [vmem:[#allocation17 + $0x1c] sm:$0xf]  ;;  %v3483_v5 = vld [vmem:[#allocation17 + $0x24] sm:$0xf0]  ;;  %v3489_v52 = vld [vmem:[#allocation17 + $0x20] sm:$0xf]  ;;  %v3494_v46 = vor.u32 %v3672_v26, %v3493_v61 }
 0x76a   : > { %v3670_v54 = vld [vmem:[#allocation17 + $0x28] sm:$0xf0]  ;;  %v3486_v51 = vor.u32 %v3668_v16, %v3483_v5  ;;  %v3481_v19 = vld [vmem:[#allocation17 + $0x18] sm:$0xf]  ;;  %v3669_v20 = vld [vmem:[#allocation17 + $0x20] sm:$0xf0] }
 0x76b   : > { %3699 = vmatpush.bf16.msra.mxu3 %v3530_v50  ;;  %2709 = vmatpush.bf16.msra.mxu0 %v3530_v50  ;;  %v3490_v21 = vor.u32 %v3670_v54, %v3489_v52  ;;  %v3665_v23 = vld [vmem:[#allocation17 + $0x4] sm:$0xf]  ;;  %v3471_v27 = vld [vmem:[#allocation17 + $0xc] sm:$0xf0]  ;;  %v3477_v24 = vld [vmem:[#allocation17 + $0x8] sm:$0xf]  ;;  %v3482_v15 = vor.u32 %v3669_v20, %v3481_v19 }
 0x76c   : > { %2729 = vmatpush.bf16.msra.mxu1 %v3522_v37  ;;  %v3667_v41 = vld [vmem:[#allocation17 + $0x10] sm:$0xf0]  ;;  %v3474_v56 = vor.u32 %v3665_v23, %v3471_v27  ;;  %v3469_v29 = vld [vmem:[#allocation17] sm:$0xf]  ;;  %v3666_v22 = vld [vmem:[#allocation17 + $0x8] sm:$0xf0] }
 0x76d   : > { %2748 = vmatpush.bf16.msra.mxu2 %v3526_v62  ;;  %v3478_v31 = vor.u32 %v3667_v41, %v3477_v24  ;;  %v3470_v34 = vor.u32 %v3666_v22, %v3469_v29  ;;  %v2571_v53 = vld [vmem:[%s5116_s28] sm:$0x7] }
 0x76e   : > { %v2574_v4 = vperm.slane %v2571_v53, 1  ;;  %v2573_v40 = vperm.slane %v2571_v53, 0  ;;  %v2575_v17 = vperm.slane %v2571_v53, 2 }
 0x76f   : > { %3700 = vmatpush.bf16.msra.mxu3 %v3518_v6  ;;  %2710 = vmatpush.bf16.msra.mxu0 %v3518_v6 }
 0x770   : > { %2730 = vmatpush.bf16.msra.mxu1 %v3510_v7 }
 0x771   : > { %2749 = vmatpush.bf16.msra.mxu2 %v3514_v43 }
 0x773   : > { %3701 = vmatpush.bf16.msra.mxu3 %v3506_v3  ;;  %2711 = vmatpush.bf16.msra.mxu0 %v3506_v3 }
 0x774   : > { %2731 = vmatpush.bf16.msra.mxu1 %v3498_v18 }
 0x775   : > { %2750 = vmatpush.bf16.msra.mxu2 %v3502_v14 }
 0x777   : > { %3702 = vmatpush.bf16.msra.mxu3 %v3494_v46  ;;  %2712 = vmatpush.bf16.msra.mxu0 %v3494_v46 }
 0x778   : > { %2732 = vmatpush.bf16.msra.mxu1 %v3486_v51 }
 0x779   : > { %2751 = vmatpush.bf16.msra.mxu2 %v3490_v21 }
 0x77b   : > { %3703 = vmatpush.bf16.msra.mxu3 %v3482_v15  ;;  %2713 = vmatpush.bf16.msra.mxu0 %v3482_v15 }
 0x77c   : > { %2733 = vmatpush.bf16.msra.mxu1 %v3474_v56 }
 0x77d   : > { %2752 = vmatpush.bf16.msra.mxu2 %v3478_v31 }
 0x77f   : > { %2734 = vmatmul.bf16.vlgmr.msra.gmra.mxu1 %v2569_v25  ;;  %3704 = vmatpush.bf16.msra.mxu3 %v3470_v34 }
 0x780   : > { %2753 = vmatmul.bf16.vlgmr.msra.gmra.mxu2 %v2569_v25  ;;  %2714 = vmatpush.bf16.msra.mxu0 %v3470_v34 }
 0x782   : > { %2720 = vmatmul.bf16.vlgmr.msra.gmra.mxu3 %v2570_v32 }
 0x783   : > { %2715 = vmatmul.bf16.vlgmr.msra.gmra.mxu0 %v2569_v25 }
 0x78f   : > { %2739 = vmatmul.bf16.gmra.mxu1 %v2570_v32 }
 0x790   : > { %2758 = vmatmul.bf16.gmra.mxu2 %v2570_v32 }
 0x7fc   : > { %v2735_v39 = vpop.f32.mrf.mxu1 }
 0x7fd   : > { %v2736_v28 = vadd.f32 %v2735_v39, %v2574_v4 }
 0x7ff   : > { %2765 = vst [vmem:[%s5117_s6 + $0x8] sm:$0xff] %v2736_v28 }
 0x800   : > { %v2716_v59 = vpop.f32.mrf.mxu0 }
 0x801   : > { %v2717_v42 = vadd.f32 %v2716_v59, %v2573_v40 }
 0x803   : > { %v2754_v57 = vpop.f32.mrf.mxu2  ;;  %2764 = vst [vmem:[%s5117_s6] sm:$0xff] %v2717_v42 }
 0x804   : > { %v2755_v35 = vadd.f32 %v2754_v57, %v2575_v17  ;;  %v2737_v36 = vpop.f32.mrf.mxu1 }
 0x805   : > { %v2738_v44 = vadd.f32 %v2737_v36, %v2574_v4  ;;  %v2721_v30 = vpop.f32.mrf.mxu3 }
 0x806   : > { %2766 = vst [vmem:[%s5117_s6 + $0x10] sm:$0xff] %v2755_v35  ;;  %v2722_v55 = vadd.f32 %v2721_v30, %v2573_v40 }
 0x807   : > { %2768 = vst [vmem:[%s5117_s6 + $0x20] sm:$0xff] %v2738_v44 }
 0x808   : > { %2770 = vst [vmem:[%s5117_s6 + $0x30] sm:$0xff] %v2722_v55  ;;  %v2718_v38 = vpop.f32.mrf.mxu0 }
 0x809   : > { %v2719_v45 = vadd.f32 %v2718_v38, %v2573_v40 }
 0x80b   : > { %v2756_v47 = vpop.f32.mrf.mxu2  ;;  %2767 = vst [vmem:[%s5117_s6 + $0x18] sm:$0xff] %v2719_v45 }
 0x80c   : > { %v2757_v48 = vadd.f32 %v2756_v47, %v2575_v17  ;;  %v2740_v33 = vpop.f32.mrf.mxu1 }
 0x80d   : > { %v2741_v49 = vadd.f32 %v2740_v33, %v2574_v4  ;;  %v2723_v50 = vpop.f32.mrf.mxu3 }
 0x80e   : > { %2769 = vst [vmem:[%s5117_s6 + $0x28] sm:$0xff] %v2757_v48  ;;  %v2724_v37 = vadd.f32 %v2723_v50, %v2573_v40 }
 0x80f   : > { %2771 = vst [vmem:[%s5117_s6 + $0x38] sm:$0xff] %v2741_v49 }
 0x810   : > { %2773 = vst [vmem:[%s5117_s6 + $0x48] sm:$0xff] %v2724_v37 }
 0x813   : > { %v2759_v58 = vpop.f32.mrf.mxu2 }
 0x814   : > { %v2760_v60 = vadd.f32 %v2759_v58, %v2575_v17  ;;  %v2742_v62 = vpop.f32.mrf.mxu1 }
 0x815   : > { %v2743_v63 = vadd.f32 %v2742_v62, %v2574_v4 }
 0x816   : > { %2772 = vst [vmem:[%s5117_s6 + $0x40] sm:$0xff] %v2760_v60 }
 0x817   : > { %2774 = vst [vmem:[%s5117_s6 + $0x50] sm:$0xff] %v2743_v63 }
 0x81b   : > { %v2761_v0 = vpop.f32.mrf.mxu2 }
 0x81c   : > { %v2762_v1 = vadd.f32 %v2761_v0, %v2575_v17 }
 0x81e   : > { %2775 = vst [vmem:[%s5117_s6 + $0x58] sm:$0xff] %v2762_v1 }
 0x81f PF: > { %s41_s23 = sadd.s32 1, %s4249_s23   ;;  %s5118_s7 = sld [smem:[#allocation25_spill]] }
 0x820   : > { %p38_p4 = scmp.ge.s32.totalorder %s41_s23, 4   ;;  %s5119_s20 = sld [smem:[#allocation27_spill]] }
 0x821   : > { %s5120_s24 = sld [smem:[#allocation26_spill]]  ;;  %s5121_s18 = smov %s4233_s19 }
 0x822   : > { %s5123_s21 = smov %s4245_s22 }
 0x823   :  { %40 = sbr.rel (!%p38_p4) target bundleno = 25 (0x19), region = 240 }
 0x825   : > { %s5122_s19 = smov %s5118_s7 }
 0x827   : > { %s5124_s22 = smov %s5120_s24 }
 0x828   :  { %2800 = vsyncpa [#allocation4], 1 }
 0x829   :  { %2802 = vsyncpa [#allocation4 + $0x1], 1 }
 0x82a   :  { %2803 = vsyncpa [#allocation6], 1 }
 0x82b   :  { %2805 = vsyncpa [#allocation6 + $0x1], 1 }
 0x82c   :  { %2806 = vsyncpa [#allocation9], 1 }
 0x82d   :  { %2808 = vsyncpa [#allocation9 + $0x1], 1 }
 0x82e   :  { %2809 = vsyncpa [#allocation12], 1 }
 0x82f   :  { %2811 = vsyncpa [#allocation12 + $0x1], 1 }
 0x830   :  { %2812 = vsyncpa [#allocation15], 1 }
 0x831   :  { %2814 = vsyncpa [#allocation15 + $0x1], 1 }
 0x832   :  { %2815 = vsyncpa [#allocation18], 1 }

</bundles_post_ra>
